<compile_context>
chip_gen: v7x
topology: tpu7x:2x2x1
jax: 0.10.0
libtpu: 0.0.40
codegen_flags: <defaults>
</compile_context>

<pallas_src>
import functools
from typing import NamedTuple

import jax
import jax.numpy as jnp
from jax import lax
from jax.experimental import pallas as pl
from jax.experimental.pallas import tpu as pltpu

BN_EPS = 1e-5
_LANE = 128
_SUBLANE = 8
_ROW_ALIGN = 16                      # bf16-friendly sublane packing
_VMEM = pltpu.MemorySpace.VMEM


def _round_up(v, m):
    return (v + m - 1) // m * m


def _pad2d(a, rows, cols):
    r, c = a.shape
    if r == rows and c == cols:
        return a
    return jnp.pad(a, ((0, rows - r), (0, cols - c)))


def _device_defaults():
    """Per-generation (scoped-VMEM limit, default row-tile)."""
    try:
        phys = int(pltpu.get_tpu_info().vmem_capacity_bytes)
    except Exception:                 # conservative if the query is unavailable
        phys = 64 * 1024 * 1024
    if phys >= 128 * 1024 * 1024:     # v5e / v6e: plenty of VMEM headroom
        return 96 * 1024 * 1024, 512
    return 32 * 1024 * 1024, 256      # v7x (64 MiB physical)


def _pick_tm(n, max_rows):
    """Row-tile size: multiple of 16, evened across tiles to minimise tail waste."""
    if n <= max_rows:
        return max(_ROW_ALIGN, _round_up(n, _ROW_ALIGN))
    num_tiles = pl.cdiv(n, max_rows)
    return _round_up(pl.cdiv(n, num_tiles), _ROW_ALIGN)


def _const_spec(shape):
    """Grid-invariant operand: constant index_map, single-buffered (no prefetch buffer)."""
    index_map = lambda *_: (0,) * len(shape)
    try:
        return pl.BlockSpec(shape, index_map, memory_space=_VMEM,
                            pipeline_mode=pl.Buffered(1))
    except (TypeError, AttributeError):   # defensive: older BlockSpec signature
        return pl.BlockSpec(shape, index_map, memory_space=_VMEM)


class PreparedParams(NamedTuple):
    w1: jax.Array      # (f_p, h_p)  compute dtype (pre-transposed: x @ w1)
    b1: jax.Array      # (1, h_p)    f32
    gamma: jax.Array   # (1, h_p)    f32
    beta: jax.Array    # (1, h_p)    f32
    w2: jax.Array      # (h_p, c_p)  compute dtype
    b2: jax.Array      # (1, c_p)    f32
    nfeat: int
    nhid: int
    nclass: int


def prepare_params(params, *, compute_dtype=jnp.bfloat16):
    """Pad / cast parameters ONCE (hoisted out of the per-call path)."""
    w1, b1, gamma, beta, w2, b2 = params
    nfeat, nhid = w1.shape
    nclass = w2.shape[1]
    f_p, h_p, c_p = (_round_up(d, _LANE) for d in (nfeat, nhid, nclass))
    as_row = lambda v: v.reshape(1, -1).astype(jnp.float32)
    return PreparedParams(
        w1=_pad2d(w1.astype(compute_dtype), f_p, h_p),
        b1=_pad2d(as_row(b1), 1, h_p),
        gamma=_pad2d(as_row(gamma), 1, h_p),
        beta=_pad2d(as_row(beta), 1, h_p),
        w2=_pad2d(w2.astype(compute_dtype), h_p, c_p),
        b2=_pad2d(as_row(b2), 1, c_p),
        nfeat=nfeat, nhid=nhid, nclass=nclass)


# --------------------------------------------------------------------------- #
# Fused single-kernel path: h stays VMEM-resident.                             #
# --------------------------------------------------------------------------- #
def _fused_kernel(x_ref, w1_ref, b1_ref, gamma_ref, beta_ref, w2_ref, b2_ref,
                  o_ref,
                  h_buf, s1_ref, s2_ref, scale_ref, shift_ref,
                  *, n_rows, num_tiles, block_rows, use_bn):
    """grid = (phase, row_tile).
    phase 0: h tile = x @ W1 + b1 -> VMEM scratch, accumulate batch stats.
    phase 1: (i == 0) fold BN into scale/shift; then ReLU(h*scale+shift) @ W2 + b2."""
    phase = pl.program_id(0)
    i = pl.program_id(1)
    ragged = n_rows != num_tiles * block_rows
    tail_rows = n_rows - (num_tiles - 1) * block_rows

    @pl.when(phase == 0)
    def _phase0():
        if use_bn:
            @pl.when(i == 0)
            def _init():
                s1_ref[...] = jnp.zeros_like(s1_ref)
                s2_ref[...] = jnp.zeros_like(s2_ref)

        # x arrives in the caller dtype; cast to the compute dtype in-kernel.
        h = jnp.dot(x_ref[...].astype(w1_ref.dtype), w1_ref[...],
                    preferred_element_type=jnp.float32) + b1_ref[...]
        h_buf[i] = h.astype(h_buf.dtype)          # never leaves VMEM

        if use_bn:
            def _acc(hm):
                s1_ref[...] += jnp.sum(hm, axis=0, keepdims=True)
                s2_ref[...] += jnp.sum(hm * hm, axis=0, keepdims=True)

            if ragged:
                # Only the final tile carries batch-padding rows to mask.
                @pl.when(i < num_tiles - 1)
                def _full():
                    _acc(h)

                @pl.when(i == num_tiles - 1)
                def _tail():
                    row = lax.broadcasted_iota(jnp.int32, (block_rows, 1), 0)
                    _acc(jnp.where(row < tail_rows, h, 0.0))
            else:
                _acc(h)

    @pl.when(phase == 1)
    def _phase1():
        if use_bn:
            @pl.when(i == 0)
            def _fold_bn():
                inv_n = 1.0 / n_rows
                mean = s1_ref[...] * inv_n
                # One-pass E[h^2]-E[h]^2 (clamped); adequate at f32 for BN-scale use.
                var = jnp.maximum(s2_ref[...] * inv_n - mean * mean, 0.0)
                scale = gamma_ref[...] * lax.rsqrt(var + BN_EPS)
                scale_ref[...] = scale
                shift_ref[...] = beta_ref[...] - mean * scale

        h = h_buf[i].astype(jnp.float32)
        if use_bn:
            h = h * scale_ref[...] + shift_ref[...]
        h = jnp.maximum(h, 0.0)
        out = jnp.dot(h.astype(w2_ref.dtype), w2_ref[...],
                      preferred_element_type=jnp.float32)
        o_ref[...] = (out + b2_ref[...]).astype(o_ref.dtype)


def _forward_fused(x_in, p, *, n, tm, num_tiles, use_bn, out_dtype, vmem_limit):
    f_p, h_p = p.w1.shape
    c_p = p.w2.shape[1]
    cd = p.w1.dtype
    n_p = num_tiles * tm

    # phase 0: stream x row tiles; phase 1: stay on the last block (no re-fetch).
    x_spec = pl.BlockSpec((tm, f_p),
                          lambda ph, i: (i + ph * (num_tiles - 1 - i), 0),
                          memory_space=_VMEM)
    # phase 0: output block parked at 0 (not written); phase 1: one block per tile.
    o_spec = pl.BlockSpec((tm, c_p), lambda ph, i: (ph * i, 0), memory_space=_VMEM)

    kernel = functools.partial(_fused_kernel, n_rows=n, num_tiles=num_tiles,
                               block_rows=tm, use_bn=use_bn)
    return pl.pallas_call(
        kernel,
        grid=(2, num_tiles),
        in_specs=[x_spec,
                  _const_spec((f_p, h_p)),    # W1
                  _const_spec((1, h_p)),      # b1
                  _const_spec((1, h_p)),      # gamma
                  _const_spec((1, h_p)),      # beta
                  _const_spec((h_p, c_p)),    # W2
                  _const_spec((1, c_p))],     # b2
        out_specs=o_spec,
        out_shape=jax.ShapeDtypeStruct((n_p, c_p), out_dtype),
        scratch_shapes=[
            pltpu.VMEM((num_tiles, tm, h_p), cd),   # resident h (no HBM round trip)
            pltpu.VMEM((1, h_p), jnp.float32),      # sum(h)
            pltpu.VMEM((1, h_p), jnp.float32),      # sum(h*h)
            pltpu.VMEM((1, h_p), jnp.float32),      # folded BN scale
            pltpu.VMEM((1, h_p), jnp.float32),      # folded BN shift
        ],
        compiler_params=pltpu.CompilerParams(
            # Phase 1 depends on all of phase 0 via VMEM-resident state, so the
            # whole grid is sequential on one TensorCore.  (Large batches where
            # megacore matters fall back to the two-pass path below.)
            dimension_semantics=("arbitrary", "arbitrary"),
            vmem_limit_bytes=vmem_limit),
    )(x_in, p.w1, p.b1, p.gamma, p.beta, p.w2, p.b2)


# --------------------------------------------------------------------------- #
# Two-pass fallback (h too large for VMEM): megacore-parallel stages.          #
# --------------------------------------------------------------------------- #
def _stage1_kernel(x_ref, w1_ref, b1_ref, h_ref, stats_ref,
                   *, num_tiles, block_rows, n_rows, use_bn):
    """h tile = x @ W1 + b1 -> HBM; per-tile partial sums (rows 0/1 of stats block)."""
    i = pl.program_id(0)
    h = jnp.dot(x_ref[...].astype(w1_ref.dtype), w1_ref[...],
                preferred_element_type=jnp.float32) + b1_ref[...]
    h_ref[...] = h.astype(h_ref.dtype)

    if use_bn:
        def _write(hm):
            stats_ref[0, 0:1, :] = jnp.sum(hm, axis=0, keepdims=True)
            stats_ref[0, 1:2, :] = jnp.sum(hm * hm, axis=0, keepdims=True)

        if n_rows != num_tiles * block_rows:
            @pl.when(i < num_tiles - 1)
            def _full():
                _write(h)

            @pl.when(i == num_tiles - 1)
            def _tail():
                tail_rows = n_rows - (num_tiles - 1) * block_rows
                row = lax.broadcasted_iota(jnp.int32, (block_rows, 1), 0)
                _write(jnp.where(row < tail_rows, h, 0.0))
        else:
            _write(h)


def _stage2_kernel(h_ref, scale_ref, shift_ref, w2_ref, b2_ref, o_ref):
    """out tile = ReLU(h*scale + shift) @ W2 + b2 (BN pre-folded; identity if no BN)."""
    h = h_ref[...].astype(jnp.float32)
    h = jnp.maximum(h * scale_ref[...] + shift_ref[...], 0.0)
    out = jnp.dot(h.astype(w2_ref.dtype), w2_ref[...],
                  preferred_element_type=jnp.float32)
    o_ref[...] = (out + b2_ref[...]).astype(o_ref.dtype)


def _forward_two_pass(x_in, p, *, n, tm, num_tiles, use_bn, out_dtype, vmem_limit):
    f_p, h_p = p.w1.shape
    c_p = p.w2.shape[1]
    cd = p.w1.dtype
    n_p = num_tiles * tm

    h_pad, stats = pl.pallas_call(
        functools.partial(_stage1_kernel, num_tiles=num_tiles, block_rows=tm,
                          n_rows=n, use_bn=use_bn),
        grid=(num_tiles,),
        in_specs=[pl.BlockSpec((tm, f_p), lambda i: (i, 0), memory_space=_VMEM),
                  _const_spec((f_p, h_p)),
                  _const_spec((1, h_p))],
        out_specs=(pl.BlockSpec((tm, h_p), lambda i: (i, 0), memory_space=_VMEM),
                   pl.BlockSpec((1, _SUBLANE, h_p), lambda i: (i, 0, 0),
                                memory_space=_VMEM)),
        out_shape=(jax.ShapeDtypeStruct((n_p, h_p), cd),
                   jax.ShapeDtypeStruct((num_tiles, _SUBLANE, h_p), jnp.float32)),
        compiler_params=pltpu.CompilerParams(
            dimension_semantics=("parallel",),    # megacore-shardable on v7x
            vmem_limit_bytes=vmem_limit),
    )(x_in, p.w1, p.b1)

    if use_bn:
        # Fold BN into a single scale/shift pair ONCE (tiny (1, h_p) JAX op).
        s1 = jnp.sum(stats[:, 0, :], axis=0, keepdims=True)
        s2 = jnp.sum(stats[:, 1, :], axis=0, keepdims=True)
        mean = s1 / n
        var = jnp.maximum(s2 / n - mean * mean, 0.0)
        scale = p.gamma * lax.rsqrt(var + BN_EPS)
        shift = p.beta - mean * scale
    else:
        scale = jnp.ones((1, h_p), jnp.float32)
        shift = jnp.zeros((1, h_p), jnp.float32)

    return pl.pallas_call(
        _stage2_kernel,
        grid=(num_tiles,),
        in_specs=[pl.BlockSpec((tm, h_p), lambda i: (i, 0), memory_space=_VMEM),
                  _const_spec((1, h_p)),
                  _const_spec((1, h_p)),
                  _const_spec((h_p, c_p)),
                  _const_spec((1, c_p))],
        out_specs=pl.BlockSpec((tm, c_p), lambda i: (i, 0), memory_space=_VMEM),
        out_shape=jax.ShapeDtypeStruct((n_p, c_p), out_dtype),
        compiler_params=pltpu.CompilerParams(
            dimension_semantics=("parallel",),
            vmem_limit_bytes=vmem_limit),
    )(h_pad, scale, shift, p.w2, p.b2)


# --------------------------------------------------------------------------- #
# Public wrapper (mirrors MLP.forward(self, _, x)).                            #
# --------------------------------------------------------------------------- #
def mlp_forward(graph_unused, x, prepared, *, use_bn=True, out_dtype=jnp.float32,
                block_rows=None, vmem_limit_bytes=None, force_two_pass=False):
    del graph_unused                               # unused, as in the torch module
    p = prepared
    n, nfeat = x.shape
    assert nfeat == p.nfeat, "x feature dim does not match prepared params"
    f_p, h_p = p.w1.shape
    c_p = p.w2.shape[1]
    cd_bytes = jnp.dtype(p.w1.dtype).itemsize

    default_vmem, default_rows = _device_defaults()
    vmem_limit = vmem_limit_bytes or default_vmem
    tm = _pick_tm(n, block_rows or default_rows)
    num_tiles = pl.cdiv(n, tm)

    # x keeps its caller dtype (in-kernel cast); rows are never padded (the
    # ragged tail is handled in-kernel).  Lane-pad features only if needed.
    x_in = x if nfeat == f_p else jnp.pad(x, ((0, 0), (0, f_p - nfeat)))

    # Fused path keeps the whole h in VMEM; fall back when it would not fit
    # alongside the (single-buffered) weights and the x / out pipeline buffers.
    fused_bytes = (num_tiles * tm * h_p * cd_bytes             # resident h
                   + (f_p + c_p) * h_p * cd_bytes              # W1 + W2 (1 buffer)
                   + 2 * tm * f_p * x_in.dtype.itemsize        # x double buffer
                   + 2 * tm * c_p * jnp.dtype(out_dtype).itemsize
                   + 16 * h_p * 4)                             # stats / scale vectors
    use_fused = (not force_two_pass) and fused_bytes <= int(0.8 * vmem_limit)

    fwd = _forward_fused if use_fused else _forward_two_pass
    out_pad = fwd(x_in, p, n=n, tm=tm, num_tiles=num_tiles, use_bn=use_bn,
                  out_dtype=out_dtype, vmem_limit=vmem_limit)
    # NOTE: consumers that can take the padded (n_p, c_p) slab should, to skip
    # this extra copy; sliced here to match the torch module contract.
    return out_pad[:n, :p.nclass]


def init_params(key, nfeat, nhid, nclass):
    """Deterministic synthetic init matching the PyTorch parameter shapes."""
    k1, k2, k3, k4 = jax.random.split(key, 4)
    lim1 = 1.0 / jnp.sqrt(nfeat)
    w1 = jax.random.uniform(k1, (nfeat, nhid), jnp.float32, -lim1, lim1)
    b1 = jax.random.uniform(k2, (1, nhid), jnp.float32, -lim1, lim1)
    gamma = jnp.ones((1, nhid), jnp.float32)        # BatchNorm1d default init
    beta = jnp.zeros((1, nhid), jnp.float32)
    lim2 = 1.0 / jnp.sqrt(nhid)
    w2 = jax.random.uniform(k3, (nhid, nclass), jnp.float32, -lim2, lim2)
    b2 = jax.random.uniform(k4, (1, nclass), jnp.float32, -lim2, lim2)
    return (w1, b1, gamma, beta, w2, b2)


def _reference(x, params, compute_dtype=jnp.float32, use_bn=True):
    """Pure-JAX mirror of the PyTorch training-mode forward."""
    w1, b1, gamma, beta, w2, b2 = params
    cd = compute_dtype
    h = jnp.dot(x.astype(cd), w1.astype(cd),
                preferred_element_type=jnp.float32) + b1
    if use_bn:
        mean = jnp.mean(h, axis=0, keepdims=True)
        var = jnp.mean((h - mean) ** 2, axis=0, keepdims=True)   # biased variance
        h = (h - mean) * lax.rsqrt(var + BN_EPS) * gamma + beta
    h = jnp.maximum(h, 0.0)
    return jnp.dot(h.astype(cd), w2.astype(cd),
                   preferred_element_type=jnp.float32) + b2


if __name__ == "__main__":
    # Deliberately unaligned shapes: exercise lane padding, multi-tile grids and
    # the ragged-tail batch mask.
    nfeat, nhid, nclass, n_nodes = 48, 64, 10, 300

    key = jax.random.PRNGKey(0)
    kx, kp = jax.random.split(key)
    x = jax.random.normal(kx, (n_nodes, nfeat), jnp.float32)
    raw_params = init_params(kp, nfeat, nhid, nclass)

    # Parameters are padded / cast once, outside the per-call path.
    params_bf16 = prepare_params(raw_params, compute_dtype=jnp.bfloat16)
    params_f32 = prepare_params(raw_params, compute_dtype=jnp.float32)

    ref_bf16 = _reference(x, raw_params, compute_dtype=jnp.bfloat16)
    ref_f32 = _reference(x, raw_params, compute_dtype=jnp.float32)
    ref_nobn = _reference(x, raw_params, compute_dtype=jnp.bfloat16, use_bn=False)

    tol = dict(atol=2e-2, rtol=2e-2)

    # 1) Fused path, device-default tiling, bf16 compute.
    out = jax.block_until_ready(mlp_forward(None, x, params_bf16))
    assert out.shape == (n_nodes, nclass)
    assert jnp.allclose(out, ref_bf16, **tol), "fused bf16 (default tiling) mismatch"

    # 2) Fused path, forced multi-tile grid with a ragged tail (block_rows=128).
    out = jax.block_until_ready(mlp_forward(None, x, params_bf16, block_rows=128))
    assert jnp.allclose(out, ref_bf16, **tol), "fused bf16 (multi-tile) mismatch"

    # 3) Fused path, full-f32 compute.
    out = jax.block_until_ready(mlp_forward(None, x, params_f32, block_rows=128))
    assert jnp.allclose(out, ref_f32, **tol), "fused f32 mismatch"

    # 4) Fused path without BatchNorm.
    out = jax.block_until_ready(
        mlp_forward(None, x, params_bf16, use_bn=False, block_rows=128))
    assert jnp.allclose(out, ref_nobn, **tol), "fused no-BN mismatch"

    # 5) Two-pass fallback (large-batch path), bf16 compute.
    out = jax.block_until_ready(
        mlp_forward(None, x, params_bf16, block_rows=128, force_two_pass=True))
    assert jnp.allclose(out, ref_bf16, **tol), "two-pass bf16 mismatch"

    # 6) Two-pass fallback without BatchNorm.
    out = jax.block_until_ready(
        mlp_forward(None, x, params_bf16, use_bn=False, block_rows=128,
                    force_two_pass=True))
    assert jnp.allclose(out, ref_nobn, **tol), "two-pass no-BN mismatch"

    print("KERNEL_OK")
</pallas_src>

<mosaic_0001>
module attributes {stable_mosaic.version = 11 : i64} {
  func.func @_fused_kernel(%arg0: i32, %arg1: i32, %arg2: memref<160x128xf32, #tpu.memory_space<vmem>>, %arg3: memref<128x128xbf16, #tpu.memory_space<vmem>>, %arg4: memref<1x128xf32, #tpu.memory_space<vmem>>, %arg5: memref<1x128xf32, #tpu.memory_space<vmem>>, %arg6: memref<1x128xf32, #tpu.memory_space<vmem>>, %arg7: memref<128x128xbf16, #tpu.memory_space<vmem>>, %arg8: memref<1x128xf32, #tpu.memory_space<vmem>>, %arg9: memref<160x128xf32, #tpu.memory_space<vmem>>, %arg10: memref<2x160x128xbf16, #tpu.memory_space<vmem>>, %arg11: memref<1x128xf32, #tpu.memory_space<vmem>>, %arg12: memref<1x128xf32, #tpu.memory_space<vmem>>, %arg13: memref<1x128xf32, #tpu.memory_space<vmem>>, %arg14: memref<1x128xf32, #tpu.memory_space<vmem>>) attributes {dimension_semantics = [#tpu.dimension_semantics<arbitrary>, #tpu.dimension_semantics<arbitrary>], iteration_bounds = array<i64: 2, 2>, scalar_prefetch = 0 : i64, scratch_operands = 5 : i64, tpu.core_type = #tpu.core_type<tc>, window_params = [{transform_indices = @transform_0, window_bounds = array<i64: 160, 128>}, {pipeline_mode = #tpu.pipeline_mode<synchronous>, transform_indices = @transform_1, window_bounds = array<i64: 128, 128>}, {pipeline_mode = #tpu.pipeline_mode<synchronous>, transform_indices = @transform_2, window_bounds = array<i64: 1, 128>}, {pipeline_mode = #tpu.pipeline_mode<synchronous>, transform_indices = @transform_3, window_bounds = array<i64: 1, 128>}, {pipeline_mode = #tpu.pipeline_mode<synchronous>, transform_indices = @transform_4, window_bounds = array<i64: 1, 128>}, {pipeline_mode = #tpu.pipeline_mode<synchronous>, transform_indices = @transform_5, window_bounds = array<i64: 128, 128>}, {pipeline_mode = #tpu.pipeline_mode<synchronous>, transform_indices = @transform_6, window_bounds = array<i64: 1, 128>}, {transform_indices = @transform_7, window_bounds = array<i64: 160, 128>}]} {
    %c0_i32 = arith.constant 0 : i32
    %0 = arith.cmpi eq, %arg0, %c0_i32 : i32
    %1 = arith.extui %0 : i1 to i32
    %c0_i32_0 = arith.constant 0 : i32
    %2 = arith.cmpi ne, %1, %c0_i32_0 : i32
    scf.if %2 {
      %c0_i32_2 = arith.constant 0 : i32
      %6 = arith.cmpi eq, %arg1, %c0_i32_2 : i32
      %7 = arith.extui %6 : i1 to i32
      %c0_i32_3 = arith.constant 0 : i32
      %8 = arith.cmpi ne, %7, %c0_i32_3 : i32
      scf.if %8 {
        %cst_15 = arith.constant 0.000000e+00 : f32
        %27 = vector.broadcast %cst_15 : f32 to vector<1x128xf32>
        %c0_16 = arith.constant 0 : index
        %c0_17 = arith.constant 0 : index
        %28 = vector.load %arg11[%c0_16, %c0_17] : memref<1x128xf32, #tpu.memory_space<vmem>>, vector<1x128xf32>
        tpu.vector_store %arg11[%c0_16, %c0_17], %27 {strides = array<i32>} : memref<1x128xf32, #tpu.memory_space<vmem>>, vector<1x128xf32>,
        %cst_18 = arith.constant 0.000000e+00 : f32
        %29 = vector.broadcast %cst_18 : f32 to vector<1x128xf32>
        %c0_19 = arith.constant 0 : index
        %c0_20 = arith.constant 0 : index
        %30 = vector.load %arg12[%c0_19, %c0_20] : memref<1x128xf32, #tpu.memory_space<vmem>>, vector<1x128xf32>
        tpu.vector_store %arg12[%c0_19, %c0_20], %29 {strides = array<i32>} : memref<1x128xf32, #tpu.memory_space<vmem>>, vector<1x128xf32>,
      } else {
      }
      %c0 = arith.constant 0 : index
      %c0_4 = arith.constant 0 : index
      %9 = vector.load %arg2[%c0, %c0_4] : memref<160x128xf32, #tpu.memory_space<vmem>>, vector<160x128xf32>
      %10 = arith.truncf %9 : vector<160x128xf32> to vector<160x128xbf16>
      %c0_5 = arith.constant 0 : index
      %c0_6 = arith.constant 0 : index
      %11 = vector.load %arg3[%c0_5, %c0_6] : memref<128x128xbf16, #tpu.memory_space<vmem>>, vector<128x128xbf16>
      %cst = arith.constant dense<0.000000e+00> : vector<160x128xf32>
      %12 = tpu.matmul %10, %11, %cst {dimension_numbers = #tpu.dot_dimension_numbers<[1], [0], [0], [1], [0, 0, 1, 1], [], []>} : vector<160x128xbf16>, vector<128x128xbf16>, vector<160x128xf32> -> vector<160x128xf32>
      %c0_7 = arith.constant 0 : index
      %c0_8 = arith.constant 0 : index
      %13 = vector.load %arg4[%c0_7, %c0_8] : memref<1x128xf32, #tpu.memory_space<vmem>>, vector<1x128xf32>
      %14 = vector.broadcast %13 : vector<1x128xf32> to vector<160x128xf32>
      %15 = arith.addf %12, %14 : vector<160x128xf32>
      %16 = arith.truncf %15 : vector<160x128xf32> to vector<160x128xbf16>
      %17 = arith.index_cast %arg1 : i32 to index
      %c0_9 = arith.constant 0 : index
      %c0_10 = arith.constant 0 : index
      %18 = vector.load %arg10[%17, %c0_9, %c0_10] : memref<2x160x128xbf16, #tpu.memory_space<vmem>>, vector<1x160x128xbf16>
      %19 = vector.shape_cast %18 : vector<1x160x128xbf16> to vector<160x128xbf16>
      %20 = vector.shape_cast %16 : vector<160x128xbf16> to vector<1x160x128xbf16>
      tpu.vector_store %arg10[%17, %c0_9, %c0_10], %20 {strides = array<i32>} : memref<2x160x128xbf16, #tpu.memory_space<vmem>>, vector<1x160x128xbf16>,
      %c1_i32_11 = arith.constant 1 : i32
      %21 = arith.cmpi slt, %arg1, %c1_i32_11 : i32
      %22 = arith.extui %21 : i1 to i32
      %c0_i32_12 = arith.constant 0 : i32
      %23 = arith.cmpi ne, %22, %c0_i32_12 : i32
      scf.if %23 {
        %c0_15 = arith.constant 0 : index
        %c0_16 = arith.constant 0 : index
        %27 = vector.load %arg11[%c0_15, %c0_16] : memref<1x128xf32, #tpu.memory_space<vmem>>, vector<1x128xf32>
        %cst_17 = arith.constant dense<0.000000e+00> : vector<128xf32>
        %28 = vector.multi_reduction <add>, %15, %cst_17 [0] : vector<160x128xf32> to vector<128xf32>
        %29 = vector.shape_cast %28 : vector<128xf32> to vector<1x128xf32>
        %30 = arith.addf %27, %29 : vector<1x128xf32>
        %c0_18 = arith.constant 0 : index
        %c0_19 = arith.constant 0 : index
        %31 = vector.load %arg11[%c0_18, %c0_19] : memref<1x128xf32, #tpu.memory_space<vmem>>, vector<1x128xf32>
        tpu.vector_store %arg11[%c0_18, %c0_19], %30 {strides = array<i32>} : memref<1x128xf32, #tpu.memory_space<vmem>>, vector<1x128xf32>,
        %c0_20 = arith.constant 0 : index
        %c0_21 = arith.constant 0 : index
        %32 = vector.load %arg12[%c0_20, %c0_21] : memref<1x128xf32, #tpu.memory_space<vmem>>, vector<1x128xf32>
        %33 = arith.mulf %15, %15 : vector<160x128xf32>
        %cst_22 = arith.constant dense<0.000000e+00> : vector<128xf32>
        %34 = vector.multi_reduction <add>, %33, %cst_22 [0] : vector<160x128xf32> to vector<128xf32>
        %35 = vector.shape_cast %34 : vector<128xf32> to vector<1x128xf32>
        %36 = arith.addf %32, %35 : vector<1x128xf32>
        %c0_23 = arith.constant 0 : index
        %c0_24 = arith.constant 0 : index
        %37 = vector.load %arg12[%c0_23, %c0_24] : memref<1x128xf32, #tpu.memory_space<vmem>>, vector<1x128xf32>
        tpu.vector_store %arg12[%c0_23, %c0_24], %36 {strides = array<i32>} : memref<1x128xf32, #tpu.memory_space<vmem>>, vector<1x128xf32>,
      } else {
      }
      %c1_i32_13 = arith.constant 1 : i32
      %24 = arith.cmpi eq, %arg1, %c1_i32_13 : i32
      %25 = arith.extui %24 : i1 to i32
      %c0_i32_14 = arith.constant 0 : i32
      %26 = arith.cmpi ne, %25, %c0_i32_14 : i32
      scf.if %26 {
        %27 = tpu.iota {dimensions = array<i32: 0>} : vector<160x1xi32>
        %c140_i32 = arith.constant 140 : i32
        %28 = vector.broadcast %c140_i32 : i32 to vector<160x1xi32>
        %29 = arith.cmpi slt, %27, %28 : vector<160x1xi32>
        %cst_15 = arith.constant 0.000000e+00 : f32
        %30 = vector.shape_cast %29 : vector<160x1xi1> to vector<160x1xi1>
        %31 = vector.broadcast %30 : vector<160x1xi1> to vector<160x128xi1>
        %32 = vector.broadcast %cst_15 : f32 to vector<160x128xf32>
        %33 = arith.select %31, %15, %32 : vector<160x128xi1>, vector<160x128xf32>
        %c0_16 = arith.constant 0 : index
        %c0_17 = arith.constant 0 : index
        %34 = vector.load %arg11[%c0_16, %c0_17] : memref<1x128xf32, #tpu.memory_space<vmem>>, vector<1x128xf32>
        %cst_18 = arith.constant dense<0.000000e+00> : vector<128xf32>
        %35 = vector.multi_reduction <add>, %33, %cst_18 [0] : vector<160x128xf32> to vector<128xf32>
        %36 = vector.shape_cast %35 : vector<128xf32> to vector<1x128xf32>
        %37 = arith.addf %34, %36 : vector<1x128xf32>
        %c0_19 = arith.constant 0 : index
        %c0_20 = arith.constant 0 : index
        %38 = vector.load %arg11[%c0_19, %c0_20] : memref<1x128xf32, #tpu.memory_space<vmem>>, vector<1x128xf32>
        tpu.vector_store %arg11[%c0_19, %c0_20], %37 {strides = array<i32>} : memref<1x128xf32, #tpu.memory_space<vmem>>, vector<1x128xf32>,
        %c0_21 = arith.constant 0 : index
        %c0_22 = arith.constant 0 : index
        %39 = vector.load %arg12[%c0_21, %c0_22] : memref<1x128xf32, #tpu.memory_space<vmem>>, vector<1x128xf32>
        %40 = arith.mulf %33, %33 : vector<160x128xf32>
        %cst_23 = arith.constant dense<0.000000e+00> : vector<128xf32>
        %41 = vector.multi_reduction <add>, %40, %cst_23 [0] : vector<160x128xf32> to vector<128xf32>
        %42 = vector.shape_cast %41 : vector<128xf32> to vector<1x128xf32>
        %43 = arith.addf %39, %42 : vector<1x128xf32>
        %c0_24 = arith.constant 0 : index
        %c0_25 = arith.constant 0 : index
        %44 = vector.load %arg12[%c0_24, %c0_25] : memref<1x128xf32, #tpu.memory_space<vmem>>, vector<1x128xf32>
        tpu.vector_store %arg12[%c0_24, %c0_25], %43 {strides = array<i32>} : memref<1x128xf32, #tpu.memory_space<vmem>>, vector<1x128xf32>,
      } else {
      }
    } else {
    }
    %c1_i32 = arith.constant 1 : i32
    %3 = arith.cmpi eq, %arg0, %c1_i32 : i32
    %4 = arith.extui %3 : i1 to i32
    %c0_i32_1 = arith.constant 0 : i32
    %5 = arith.cmpi ne, %4, %c0_i32_1 : i32
    scf.if %5 {
      %c0_i32_2 = arith.constant 0 : i32
      %6 = arith.cmpi eq, %arg1, %c0_i32_2 : i32
      %7 = arith.extui %6 : i1 to i32
      %c0_i32_3 = arith.constant 0 : i32
      %8 = arith.cmpi ne, %7, %c0_i32_3 : i32
      scf.if %8 {
        %c0_16 = arith.constant 0 : index
        %c0_17 = arith.constant 0 : index
        %28 = vector.load %arg11[%c0_16, %c0_17] : memref<1x128xf32, #tpu.memory_space<vmem>>, vector<1x128xf32>
        %cst_18 = arith.constant 0.00333333341 : f32
        %29 = vector.broadcast %cst_18 : f32 to vector<1x128xf32>
        %30 = arith.mulf %28, %29 : vector<1x128xf32>
        %c0_19 = arith.constant 0 : index
        %c0_20 = arith.constant 0 : index
        %31 = vector.load %arg12[%c0_19, %c0_20] : memref<1x128xf32, #tpu.memory_space<vmem>>, vector<1x128xf32>
        %cst_21 = arith.constant 0.00333333341 : f32
        %32 = vector.broadcast %cst_21 : f32 to vector<1x128xf32>
        %33 = arith.mulf %31, %32 : vector<1x128xf32>
        %34 = arith.mulf %30, %30 : vector<1x128xf32>
        %35 = arith.subf %33, %34 : vector<1x128xf32>
        %cst_22 = arith.constant 0.000000e+00 : f32
        %36 = vector.broadcast %cst_22 : f32 to vector<1x128xf32>
        %37 = arith.maximumf %35, %36 : vector<1x128xf32>
        %c0_23 = arith.constant 0 : index
        %c0_24 = arith.constant 0 : index
        %38 = vector.load %arg5[%c0_23, %c0_24] : memref<1x128xf32, #tpu.memory_space<vmem>>, vector<1x128xf32>
        %cst_25 = arith.constant 9.99999974E-6 : f32
        %39 = vector.broadcast %cst_25 : f32 to vector<1x128xf32>
        %40 = arith.addf %37, %39 : vector<1x128xf32>
        %41 = math.rsqrt %40 : vector<1x128xf32>
        %42 = arith.mulf %38, %41 : vector<1x128xf32>
        %c0_26 = arith.constant 0 : index
        %c0_27 = arith.constant 0 : index
        %43 = vector.load %arg13[%c0_26, %c0_27] : memref<1x128xf32, #tpu.memory_space<vmem>>, vector<1x128xf32>
        tpu.vector_store %arg13[%c0_26, %c0_27], %42 {strides = array<i32>} : memref<1x128xf32, #tpu.memory_space<vmem>>, vector<1x128xf32>,
        %c0_28 = arith.constant 0 : index
        %c0_29 = arith.constant 0 : index
        %44 = vector.load %arg6[%c0_28, %c0_29] : memref<1x128xf32, #tpu.memory_space<vmem>>, vector<1x128xf32>
        %45 = arith.mulf %30, %42 : vector<1x128xf32>
        %46 = arith.subf %44, %45 : vector<1x128xf32>
        %c0_30 = arith.constant 0 : index
        %c0_31 = arith.constant 0 : index
        %47 = vector.load %arg14[%c0_30, %c0_31] : memref<1x128xf32, #tpu.memory_space<vmem>>, vector<1x128xf32>
        tpu.vector_store %arg14[%c0_30, %c0_31], %46 {strides = array<i32>} : memref<1x128xf32, #tpu.memory_space<vmem>>, vector<1x128xf32>,
      } else {
      }
      %9 = arith.index_cast %arg1 : i32 to index
      %c0 = arith.constant 0 : index
      %c0_4 = arith.constant 0 : index
      %10 = vector.load %arg10[%9, %c0, %c0_4] : memref<2x160x128xbf16, #tpu.memory_space<vmem>>, vector<1x160x128xbf16>
      %11 = vector.shape_cast %10 : vector<1x160x128xbf16> to vector<160x128xbf16>
      %12 = arith.extf %11 : vector<160x128xbf16> to vector<160x128xf32>
      %c0_5 = arith.constant 0 : index
      %c0_6 = arith.constant 0 : index
      %13 = vector.load %arg13[%c0_5, %c0_6] : memref<1x128xf32, #tpu.memory_space<vmem>>, vector<1x128xf32>
      %14 = vector.broadcast %13 : vector<1x128xf32> to vector<160x128xf32>
      %15 = arith.mulf %12, %14 : vector<160x128xf32>
      %c0_7 = arith.constant 0 : index
      %c0_8 = arith.constant 0 : index
      %16 = vector.load %arg14[%c0_7, %c0_8] : memref<1x128xf32, #tpu.memory_space<vmem>>, vector<1x128xf32>
      %17 = vector.broadcast %16 : vector<1x128xf32> to vector<160x128xf32>
      %18 = arith.addf %15, %17 : vector<160x128xf32>
      %cst = arith.constant 0.000000e+00 : f32
      %19 = vector.broadcast %cst : f32 to vector<160x128xf32>
      %20 = arith.maximumf %18, %19 : vector<160x128xf32>
      %21 = arith.truncf %20 : vector<160x128xf32> to vector<160x128xbf16>
      %c0_9 = arith.constant 0 : index
      %c0_10 = arith.constant 0 : index
      %22 = vector.load %arg7[%c0_9, %c0_10] : memref<128x128xbf16, #tpu.memory_space<vmem>>, vector<128x128xbf16>
      %cst_11 = arith.constant dense<0.000000e+00> : vector<160x128xf32>
      %23 = tpu.matmul %21, %22, %cst_11 {dimension_numbers = #tpu.dot_dimension_numbers<[1], [0], [0], [1], [0, 0, 1, 1], [], []>} : vector<160x128xbf16>, vector<128x128xbf16>, vector<160x128xf32> -> vector<160x128xf32>
      %c0_12 = arith.constant 0 : index
      %c0_13 = arith.constant 0 : index
      %24 = vector.load %arg8[%c0_12, %c0_13] : memref<1x128xf32, #tpu.memory_space<vmem>>, vector<1x128xf32>
      %25 = vector.broadcast %24 : vector<1x128xf32> to vector<160x128xf32>
      %26 = arith.addf %23, %25 : vector<160x128xf32>
      %c0_14 = arith.constant 0 : index
      %c0_15 = arith.constant 0 : index
      %27 = vector.load %arg9[%c0_14, %c0_15] : memref<160x128xf32, #tpu.memory_space<vmem>>, vector<160x128xf32>
      tpu.vector_store %arg9[%c0_14, %c0_15], %26 {strides = array<i32>} : memref<160x128xf32, #tpu.memory_space<vmem>>, vector<160x128xf32>,
    } else {
    }
    return
  }
  func.func @transform_0(%arg0: i32, %arg1: i32) -> (i32, i32) {
    %c1_i32 = arith.constant 1 : i32
    %0 = arith.subi %c1_i32, %arg1 : i32
    %1 = arith.muli %arg0, %0 : i32
    %2 = arith.addi %arg1, %1 : i32
    %c0_i32 = arith.constant 0 : i32
    %c0_i32_0 = arith.constant 0 : i32
    return %2, %c0_i32 : i32, i32
  }
  func.func @transform_1(%arg0: i32, %arg1: i32) -> (i32, i32) {
    %c0_i32 = arith.constant 0 : i32
    %c0_i32_0 = arith.constant 0 : i32
    %c0_i32_1 = arith.constant 0 : i32
    return %c0_i32, %c0_i32_0 : i32, i32
  }
  func.func @transform_2(%arg0: i32, %arg1: i32) -> (i32, i32) {
    %c0_i32 = arith.constant 0 : i32
    %c0_i32_0 = arith.constant 0 : i32
    %c0_i32_1 = arith.constant 0 : i32
    return %c0_i32, %c0_i32_0 : i32, i32
  }
  func.func @transform_3(%arg0: i32, %arg1: i32) -> (i32, i32) {
    %c0_i32 = arith.constant 0 : i32
    %c0_i32_0 = arith.constant 0 : i32
    %c0_i32_1 = arith.constant 0 : i32
    return %c0_i32, %c0_i32_0 : i32, i32
  }
  func.func @transform_4(%arg0: i32, %arg1: i32) -> (i32, i32) {
    %c0_i32 = arith.constant 0 : i32
    %c0_i32_0 = arith.constant 0 : i32
    %c0_i32_1 = arith.constant 0 : i32
    return %c0_i32, %c0_i32_0 : i32, i32
  }
  func.func @transform_5(%arg0: i32, %arg1: i32) -> (i32, i32) {
    %c0_i32 = arith.constant 0 : i32
    %c0_i32_0 = arith.constant 0 : i32
    %c0_i32_1 = arith.constant 0 : i32
    return %c0_i32, %c0_i32_0 : i32, i32
  }
  func.func @transform_6(%arg0: i32, %arg1: i32) -> (i32, i32) {
    %c0_i32 = arith.constant 0 : i32
    %c0_i32_0 = arith.constant 0 : i32
    %c0_i32_1 = arith.constant 0 : i32
    return %c0_i32, %c0_i32_0 : i32, i32
  }
  func.func @transform_7(%arg0: i32, %arg1: i32) -> (i32, i32) {
    %0 = arith.muli %arg0, %arg1 : i32
    %c0_i32 = arith.constant 0 : i32
    %c0_i32_0 = arith.constant 0 : i32
    return %0, %c0_i32 : i32, i32
  }
}

</mosaic_0001>

<bundles_post_ra>
// kernel: tpu_custom_call.1
= control target key start
LH: loop header
LB: loop body
LE: loop exit
PB: predicated region body
PF: predicated region fallthrough
CT: control target
= control target key end

     0   :  { %s2557_s0 = inlined_call_operand.hbm [shape: f32[300,128], index: 0, kind: input, shape index: {}]   ;;  %s2558_s1 = inlined_call_operand.hbm [shape: bf16[128,128], index: 1, kind: input, shape index: {}]   ;;  %s2559_s2 = inlined_call_operand.vmem [shape: f32[1,128], index: 2, kind: input, shape index: {}]   ;;  %s2560_s3 = inlined_call_operand.vmem [shape: f32[1,128], index: 3, kind: input, shape index: {}]   ;;  %s2561_s4 = inlined_call_operand.vmem [shape: f32[1,128], index: 4, kind: input, shape index: {}]   ;;  %s2562_s5 = inlined_call_operand.hbm [shape: bf16[128,128], index: 5, kind: input, shape index: {}]   ;;  %s2563_s6 = inlined_call_operand.vmem [shape: f32[1,128], index: 6, kind: input, shape index: {}]   ;;  %s2564_s7 = inlined_call_operand.hbm [shape: f32[320,128], index: 7, kind: output, shape index: {}]  }
   0x1   :  { %2577 = sst [smem:[#allocation24_spill]] %s2559_s2 }
   0x2   :  { %2578 = sst [smem:[#allocation25_spill]] %s2560_s3 }
   0x3   :  { %2579 = sst [smem:[#allocation26_spill]] %s2561_s4 }
   0x4   :  { %2580 = sst [smem:[#allocation27_spill]] %s2563_s6 }
   0x5   :  { %2581 = sst [smem:[#allocation28_spill]] %s2564_s7 }
   0x6   :  { %12 = vsyncpa [#allocation8], 0 }
   0x7   :  { %14 = vsyncpa [#allocation8 + $0x1], 0 }
   0x8   :  { %15 = vsyncpa [#allocation11], 0 }
   0x9   :  { %16 = vsyncpa [#allocation9], 0 }
   0xa   :  { %18 = vsyncpa [#allocation9 + $0x1], 0  ;;  %s1939_s24 = smov 0   ;;  %s1941_s25 = smov 0  }
   0xb   :  { %s1943_s26 = smov 0   ;;  %s1945_s27 = smov 0  }
   0xc   :  { %s1947_s28 = smov 0   ;;  %s1949_s29 = smov 0  }
   0xd   :  { %s1951_s30 = smov 0   ;;  %s1953_s8 = smov 0  }
   0xe   :  { %s1955_s9 = smov 0   ;;  %s1957_s10 = smov 0  }
   0xf   :  { %s1959_s11 = smov 0  }
  0x10 LB: > { %2582 = sst [smem:[#allocation17_spill]] %s1854_s26  ;;  %s2566_s12 = sadd.s32 4294967295, %s1886_s11   ;;  %s1886_s11 = sphi %s1959_s11, %s24_s11   ;;  %s1882_s10 = sphi %s1957_s10, %s2616_s10   ;;  %s1878_s9 = sphi %s1955_s9, %s2615_s9   ;;  %s1874_s8 = sphi %s1953_s8, %s2614_s8   ;;  %s1870_s30 = sphi %s1951_s30, %s2613_s30   ;;  %s1866_s29 = sphi %s1949_s29, %s2621_s29   ;;  %s1862_s28 = sphi %s1947_s28, %s2620_s28   ;;  %s1858_s27 = sphi %s1945_s27, %s2619_s27   ;;  %s1854_s26 = sphi %s1943_s26, %s2611_s26   ;;  %s1850_s25 = sphi %s1941_s25, %s2618_s25   ;;  %s1846_s24 = sphi %s1939_s24, %s2617_s24  }
  0x11   : > { %2583 = sst [smem:[#allocation18_spill]] %s1878_s9  ;;  %s33_s14 = sadd.s32 1, %s1878_s9 }
  0x12   : > { %2584 = sst [smem:[#allocation19_spill]] %s1882_s10  ;;  %s36_s15 = sadd.s32 1, %s1882_s10 }
  0x13   : > { %p34_p0 = scmp.ge.s32.totalorder %s33_s14, 2  ;;  %s40_s16 = ssub.s32 1, %s1878_s9 }
  0x14   : > { %s41_s17 = smul.u32 %s1882_s10, %s40_s16  ;;  %s49_s18 = sadd.s32 1, %s1866_s29 }
  0x15   : > { %s2623_s14 = smov (%p34_p0, %s33_s14), 0  ;;  %s2625_s15 = smov (!%p34_p0, %s36_s15), %s1882_s10 }
  0x16   : > { %2585 = sst [smem:[#allocation20_spill]] %s2623_s14  ;;  %s2003_s19 = sadd.s32 %s1878_s9, %s41_s17 }
  0x17   : > { %s43_s20 = ssub.s32 1, %s2623_s14  ;;  %p38_p1 = scmp.ge.s32.totalorder %s2625_s15, 2 }
  0x18   : > { %p56_p2 = scmp.ne.s32.totalorder %s1866_s29, %s1862_s28  ;;  %p57_p3 = scmp.eq.s32.totalorder %s1886_s11, 0 }
  0x19   : > { %p62_p4 = scmp.ne.s32.totalorder %s1862_s28, %s1858_s27  ;;  %s2627_s15 = smov (%p38_p1, %s2625_s15), 0 }
  0x1a   : > { %2586 = sst [smem:[#allocation21_spill]] %s2627_s15  ;;  %p2012_p5 = por %p57_p3, %p56_p2 }
  0x1b   : > { %p2018_p6 = scmp.eq.s32.totalorder %s2566_s12, 0  ;;  %s44_s23 = smul.u32 %s43_s20, %s2627_s15 }
  0x1c   : > { %s2587_s21 = scalar_select %p2012_p5, 1, 0 }
  0x1d   : > { %s2588_s22 = scalar_select %p2018_p6, 1, 0 }
  0x1e   : > { %s203_s27 = sadd.s32 1, %s1854_s26  ;;  %p2026_p7 = por %p2018_p6, %p62_p4 }
  0x1f   : > { %s198_s17 = smul.u32 %s1878_s9, %s1882_s10  ;;  %s45_s13 = sadd.s32 %s44_s23, %s2623_s14 }
  0x20   : > { %s2589_s16 = scalar_select %p2026_p7, 1, 0 }
  0x21   : > { %s199_s7 = smul.u32 %s2627_s15, %s2623_s14  ;;  %s46_s12 = ssub.s32 %s2003_s19, %s45_s13 }
  0x22   : > { %p213_p8 = scmp.ne.s32.totalorder %s1854_s26, %s1850_s25  ;;  %p47_p9 = scmp.eq.s32.totalorder %s46_s12, 0 }
  0x23   : > { %s200_s6 = ssub.s32 %s198_s17, %s199_s7  ;;  %s2590_s4 = sadd.s32 4294967295, %s1886_s11  }
  0x24   : > { %p201_p10 = scmp.eq.s32.totalorder %s200_s6, 0  ;;  %p214_p11 = scmp.eq.s32.totalorder %s2590_s4, 3 }
  0x25   : > { %s2041_s20 = scalar_select %p47_p9, %s1866_s29, %s49_s18  }
  0x26   : > { %s2044_s3 = scalar_select %p201_p10, %s1854_s26, %s203_s27  }
  0x27   : > { %2591 = sst [smem:[#allocation22_spill]] %s2041_s20  ;;  %p2046_p12 = por %p214_p11, %p213_p8 }
  0x28   : > { %2592 = sst [smem:[#allocation23_spill]] %s2044_s3  ;;  %p219_p13 = scmp.ne.s32.totalorder %s1850_s25, %s1846_s24 }
  0x29   : > { %s2593_s2 = scalar_select %p2046_p12, 1, 0 }
  0x2a   : > { %s2594_s10 = sadd.s32 4294967294, %s1886_s11   ;;  %p1344_p1 = scmp.ge.s32.totalorder %s1886_s11, 1 }
  0x2b   : > { %p220_p0 = scmp.eq.s32.totalorder %s2594_s10, 3  ;;  %p227_p2 = scmp.lt.s32.totalorder %s1886_s11, 5 }
  0x2c   : > { %s1888_s4 = smov [#allocation10]   ;;  %s1889_s10 = smov [#allocation12]  }
  0x2d   : > { %p2056_p3 = por %p220_p0, %p219_p13  ;;  %p2060_p4 = pnand %p1344_p1, %p227_p2 }
  0x2e   : > { %s239_s7 = sshll.u32 %s1888_s4, 4  ;;  %s261_s18 = sshll.u32 %s1889_s10, 4  ;;  %s240_s7 = int_to_ptr.vmem [resolvable:$true] %s239_s7  ;;  %s2072_s18 = int_to_ptr.vmem [resolvable:$true] %s261_s18 }
  0x2f   : > { %s2595_s12 = scalar_select %p2056_p3, 1, 0 }
  0x30   : > { %s2596_s6 = scalar_select %p2060_p4, 1, 0 }
  0x31   : > { %p1545_p8 = pneg %p2060_p4  ;;  %s1676_s17 = scalar_lea.hbm %s2558_s1, 1024 }
  0x32   : > { %p1677_p10 = scmp.ne.s32.totalorder %s2558_s1, %s1676_s17  ;;  %p1683_p1 = scmp.lt.u32.totalorder %s1676_s17, %s2558_s1 }
  0x33   : > { %p2068_p9 = pnand %p1545_p8, %p2018_p6 }
  0x35   : > { %p1678_p11 = pneg %p2068_p9 }
  0x37   : > { %p1679_p13 = pnand %p1678_p11, %p1677_p10 }
  0x39   : > { %p1680_p0 = pneg %p1679_p13 }
  0x3b   : > { %p1685_p2 = pnand %p1683_p1, %p1680_p0 }
  0x3d   : > { %1688 = shalt.err (!%p1685_p2)
}
  0x3e   : > { %s1689_s10 = scalar_lea.vmem %s240_s7, 1024  ;;  %p1697_p6 = scmp.lt.s32.totalorder %s240_s7, %s240_s7 }
  0x3f   : > { %p1690_p8 = scmp.ne.s32.totalorder %s240_s7, %s1689_s10  ;;  %p1698_p7 = scmp.lt.s32.totalorder %s1689_s10, %s1689_s10 }
  0x41   : > { %p1692_p3 = pnand %p1690_p8, %p1678_p11  ;;  %p1699_p4 = por %p1698_p7, %p1697_p6 }
  0x43   : > { %p1693_p12 = pneg %p1692_p3 }
  0x45   : > { %p1700_p5 = pnand %p1699_p4, %p1693_p12 }
  0x47   : > { %1703 = shalt.err (!%p1700_p5)
}
  0x48   : > { %s1890_s15 = smov 64   ;;  %s1891_s23 = smov 4  }
  0x49   : > { %1548 = dma.hbm_to_vmem [thread:$0]  (!%p2068_p9), %s2558_s1, 1024, %s240_s7, [#allocation11], %s1890_s15, %s1890_s15, %s1891_s23  }
  0x4a   : > { %s1704_s4 = scalar_lea.hbm %s2562_s5, 1024 }
  0x4b   : > { %p1705_p3 = scmp.ne.s32.totalorder %s2562_s5, %s1704_s4  ;;  %p1711_p7 = scmp.lt.u32.totalorder %s1704_s4, %s2562_s5 }
  0x4d   : > { %p1707_p5 = pnand %p1705_p3, %p1678_p11 }
  0x4f   : > { %p1708_p6 = pneg %p1707_p5 }
  0x51   : > { %p1713_p12 = pnand %p1711_p7, %p1708_p6 }
  0x53   : > { %1716 = shalt.err (!%p1713_p12)
}
  0x54   : > { %s1717_s7 = scalar_lea.vmem %s2072_s18, 1024  ;;  %p1725_p0 = scmp.lt.s32.totalorder %s2072_s18, %s2072_s18 }
  0x55   : > { %p1718_p4 = scmp.ne.s32.totalorder %s2072_s18, %s1717_s7  ;;  %p1726_p1 = scmp.lt.s32.totalorder %s1717_s7, %s1717_s7 }
  0x57   : > { %p1720_p10 = pnand %p1718_p4, %p1678_p11  ;;  %p1727_p2 = por %p1726_p1, %p1725_p0 }
  0x59   : > { %p1721_p13 = pneg %p1720_p10 }
  0x5b   : > { %p1728_p8 = pnand %p1727_p2, %p1721_p13 }
  0x5d   : > { %1731 = shalt.err (!%p1728_p8)
}
  0x5e   : > { %1551 = dma.hbm_to_vmem [thread:$0]  (!%p2068_p9), %s2562_s5, 1024, %s2072_s18, [#allocation11], %s1890_s15, %s1890_s15, %s1891_s23  }
  0x5f   : > { %p1347_p3 = scmp.ge.s32.totalorder %s1886_s11, 4 }
  0x60   : > { %p2598_p5 = scmp.ne.s32.totalorder (!%p1347_p3), %s2587_s21, 0 }
  0x61   : > { %274 = sbr.rel (%p1347_p3) target bundleno = 139 (0x8b), region = 40 }
  0x68   : > { %277 = sbr.rel (!%p2598_p5) target bundleno = 139 (0x8b), region = 44  ;;  %s278_s20 = sand.u32 (%p2598_p5), 1, %s1866_s29  }
  0x69   : > { %s286_s9 = smul.u32 (%p2598_p5), 20, %s2003_s19  ;;  %s2129_s4 = scalar_lea.sflag (%p2598_p5), [#allocation8], %s278_s20 }
  0x6a   : > { %s1531_s14 = smul.u32 (%p2598_p5), 160, %s278_s20 }
  0x6b   : > { %s287_s27 = ssub.s32 (%p2598_p5), 38, %s286_s9 }
  0x6c   : > { %p288_p11 = scmp.lt.s32.totalorder (%p2598_p5), %s287_s27, 20  ;;  %s282_s18 = scalar_lea.vmem (%p2598_p5), [#allocation7], %s1531_s14 }
  0x6f   : > { %s2629_s27 = smov (!%p288_p11, %s287_s27), 20 }
  0x70   : > { %s2126_s13 = sshll.u32 %s2629_s27, 7 }
  0x71   : > { %s292_s17 = ssub.s32 2560, %s2126_s13 }
  0x72   : > { %293 = vsyncadd %s2129_s4, %s292_s17  ;;  %p1349_p9 = scmp.ne.s32.totalorder %s2126_s13, 0  ;;  %s1387_s21 = smul.u32 2560, %s2003_s19 }
  0x73   : > { %s298_s15 = sshll.u32 %s282_s18, 4  ;;  %s1736_s19 = scalar_lea.hbm %s2557_s0, 4864  ;;  %s2139_s15 = int_to_ptr.vmem [resolvable:$true] %s298_s15 }
  0x74   : > { %s2137_s7 = scalar_lea.hbm %s2557_s0, %s1387_s21 }
  0x75   : > { %s1732_s3 = scalar_lea.hbm %s2137_s7, %s2126_s13  ;;  %p1737_p4 = scmp.lt.u32.totalorder %s2137_s7, %s2557_s0 }
  0x76   : > { %p1733_p6 = scmp.ne.s32.totalorder %s2137_s7, %s1732_s3  ;;  %p1738_p10 = scmp.lt.u32.totalorder %s1736_s19, %s1732_s3 }
  0x77   : > { %p1740_p0 = scmp.lt.u32.totalorder %s1732_s3, %s2137_s7 }
  0x78   : > { %p1734_p7 = pnand %p1733_p6, %p1349_p9  ;;  %p1739_p13 = por %p1738_p10, %p1737_p4 }
  0x7a   : > { %p1735_p12 = pneg %p1734_p7  ;;  %p1741_p1 = por %p1740_p0, %p1739_p13 }
  0x7c   : > { %p1742_p2 = pnand %p1741_p1, %p1735_p12 }
  0x7e   : > { %1745 = shalt.err (!%p1742_p2)
}
  0x7f   : > { %s1746_s27 = scalar_lea.vmem %s2139_s15, %s2126_s13  ;;  %s1892_s17 = smov [#allocation7]  }
  0x80   : > { %p1747_p8 = scmp.ne.s32.totalorder %s2139_s15, %s1746_s27  ;;  %s1750_s18 = sshll.u32 %s1892_s17, 4  ;;  %s1751_s18 = int_to_ptr.vmem [resolvable:$false] %s1750_s18 }
  0x81   : > { %s1752_s21 = scalar_lea.vmem %s1751_s18, 5120  ;;  %p1753_p11 = scmp.lt.s32.totalorder %s2139_s15, %s1751_s18 }
  0x82   : > { %p1748_p3 = pnand %p1747_p8, %p1349_p9  ;;  %p1754_p6 = scmp.lt.s32.totalorder %s1752_s21, %s1746_s27 }
  0x84   : > { %p1749_p5 = pneg %p1748_p3  ;;  %p1755_p7 = por %p1754_p6, %p1753_p11 }
  0x86   : > { %p1756_p4 = pnand %p1755_p7, %p1749_p5 }
  0x88   : > { %1759 = shalt.err (!%p1756_p4)
}
  0x89   : > { %s1893_s23 = smov 128   ;;  %s1894_s10 = smov 8  }
  0x8a   : > { %304 = dma.hbm_to_vmem [thread:$0]  (%p1349_p9), %s2137_s7, %s2126_s13, %s2139_s15, %s2129_s4, %s1893_s23, %s1893_s23, %s1894_s10  }
  0x8b PF: > { %p2599_p12 = scmp.ne.s32.totalorder %s2596_s6, 0 }
  0x8c   : > { %s312_s3 = sand.u32 (!%p2599_p12), 1, %s1862_s28   ;;  %p2600_p10 = scmp.ne.s32.totalorder (!%p2599_p12), %s2589_s16, 0 }
  0x8d   : > { %310 = sbr.rel (%p2599_p12) target bundleno = 860 (0x35c), region = 48  ;;  %s313_s20 = scalar_lea.sflag (!%p2599_p12), [#allocation8], %s312_s3 }
  0x8e   : > { %s1532_s26 = smul.u32 (!%p2599_p12), 160, %s312_s3 }
  0x90   : > { %s2169_s19 = scalar_lea.vmem (!%p2599_p12), [#allocation7], %s1532_s26 }
  0x94   : > { %1833 = dma.done.wait (%p2600_p10), %s313_s20, 2560  }
  0x95   : > { %1835 = vsyncadd (%p2600_p10), %s313_s20, 4294964736  ;;  %p2601_p13 = scmp.ne.s32.totalorder %s2588_s22, 0 }
  0x97   : > { %1837 = dma.done.wait (%p2601_p13), [#allocation11], 2048  }
  0x98   : > { %1839 = vsyncadd (%p2601_p13), [#allocation11], 4294965248  ;;  %s352_s6 = sand.u32 1, %s1850_s25   ;;  %p1356_p9 = scmp.ne.s32.totalorder %s1874_s8, 0 }
  0x99   : > { %s1533_s13 = smul.u32 160, %s352_s6  ;;  %p1357_p0 = scmp.ne.s32.totalorder (!%p1356_p9), %s1870_s30, 0 }
  0x9a   : > { %369 = sbr.rel (%p1356_p9) target bundleno = 527 (0x20f), region = 64 }
  0x9b   : > { %s2182_s4 = scalar_lea.vmem [#allocation13], %s1533_s13 }
  0xa1   : > { %373 = sbr.rel (%p1357_p0) target bundleno = 168 (0xa8), region = 68  ;;  %v1895_v0 = vmov (!%p1357_p0), 0.0  }
  0xa2   : > { %374 = vst [vmem:[#allocation3] sm:$0x1] (!%p1357_p0), %v1895_v0  ;;  %375 = vst [vmem:[#allocation4] sm:$0x1] (!%p1357_p0), %v1895_v0 }
  0xa8 PF: > { %v1658_v1 = vld [vmem:[#allocation10] sm:$0xff]   ;;  %v1659_v2 = vld [vmem:[#allocation10 + $0x8] sm:$0xff]   ;;  %v1660_v3 = vld [vmem:[#allocation10 + $0x10] sm:$0xff]   ;;  %s2602_s15 = sld [smem:[#allocation24_spill]]  ;;  %s1388_s7 = smul.u32 80, %s1870_s30 }
  0xa9   : > { %1427 = vmatprep.subr.bf16.mxu0 %v1658_v1  ;;  %1499 = vmatprep.subr.bf16.mxu1 %v1658_v1  ;;  %v1661_v4 = vld [vmem:[#allocation10 + $0x18] sm:$0xff]   ;;  %v376_v5 = vld [vmem:[%s2169_s19] sm:$0xff]  ;;  %v377_v6 = vld [vmem:[%s2169_s19 + $0x8] sm:$0xff]  ;;  %p1368_p1 = scmp.ge.s32.totalorder %s1870_s30, 1 }
  0xaa   : > { %1428 = vmatpush3.bf16.msra.mxu0 %v1658_v1  ;;  %1507 = vmatpush3.bf16.msra.mxu1 %v1658_v1  ;;  %v396_v7 = vpack.c.bf16 %v377_v6, %v376_v5  ;;  %v388_v8 = vld [vmem:[%s2169_s19 + $0x60] sm:$0xff]  ;;  %v389_v9 = vld [vmem:[%s2169_s19 + $0x68] sm:$0xff]  ;;  %v1664_v13 = vld [vmem:[#allocation10 + $0x30] sm:$0xff]   ;;  %s2234_s9 = scalar_lea.vmem [#allocation2], %s1388_s7 }
  0xab   : > { %1429 = vmatprep.subr.bf16.mxu0 %v1659_v2  ;;  %1500 = vmatprep.subr.bf16.mxu1 %v1659_v2  ;;  %v402_v10 = vpack.c.bf16 %v389_v9, %v388_v8  ;;  %v1662_v11 = vld [vmem:[#allocation10 + $0x20] sm:$0xff]   ;;  %v1663_v12 = vld [vmem:[#allocation10 + $0x28] sm:$0xff]   ;;  %v1665_v14 = vld [vmem:[#allocation10 + $0x38] sm:$0xff]  }
  0xac   : > { %1443 = vmatprep.mubr.bf16.mxu0 %v396_v7  ;;  %v378_v15 = vld [vmem:[%s2169_s19 + $0x10] sm:$0xff]  ;;  %v379_v16 = vld [vmem:[%s2169_s19 + $0x18] sm:$0xff]  ;;  %v380_v19 = vld [vmem:[%s2169_s19 + $0x20] sm:$0xff] }
  0xad   : > { %1455 = vmatprep.mubr.bf16.mxu1 %v402_v10  ;;  %v390_v17 = vld [vmem:[%s2169_s19 + $0x70] sm:$0xff]  ;;  %v391_v18 = vld [vmem:[%s2169_s19 + $0x78] sm:$0xff]  ;;  %v381_v20 = vld [vmem:[%s2169_s19 + $0x28] sm:$0xff]  ;;  %v397_v23 = vpack.c.bf16 %v379_v16, %v378_v15 }
  0xae   : > { %1430 = vmatpush3.bf16.msra.mxu0 %v1659_v2  ;;  %1508 = vmatpush3.bf16.msra.mxu1 %v1659_v2  ;;  %v392_v21 = vld [vmem:[%s2169_s19 + $0x80] sm:$0xff]  ;;  %v393_v22 = vld [vmem:[%s2169_s19 + $0x88] sm:$0xff]  ;;  %v403_v24 = vpack.c.bf16 %v391_v18, %v390_v17  ;;  %v398_v25 = vpack.c.bf16 %v381_v20, %v380_v19  ;;  %v382_v27 = vld [vmem:[%s2169_s19 + $0x30] sm:$0xff] }
  0xaf   : > { %1431 = vmatprep.subr.bf16.mxu0 %v1660_v3  ;;  %1501 = vmatprep.subr.bf16.mxu1 %v1660_v3  ;;  %v404_v26 = vpack.c.bf16 %v393_v22, %v392_v21  ;;  %v383_v28 = vld [vmem:[%s2169_s19 + $0x38] sm:$0xff]  ;;  %v394_v29 = vld [vmem:[%s2169_s19 + $0x90] sm:$0xff]  ;;  %v384_v31 = vld [vmem:[%s2169_s19 + $0x40] sm:$0xff] }
  0xb0   : > { %v395_v30 = vld [vmem:[%s2169_s19 + $0x98] sm:$0xff]  ;;  %v385_v32 = vld [vmem:[%s2169_s19 + $0x48] sm:$0xff]  ;;  %v399_v33 = vpack.c.bf16 %v383_v28, %v382_v27  ;;  %v386_v36 = vld [vmem:[%s2169_s19 + $0x50] sm:$0xff] }
  0xb1   : > { %v405_v34 = vpack.c.bf16 %v395_v30, %v394_v29  ;;  %v400_v35 = vpack.c.bf16 %v385_v32, %v384_v31  ;;  %v387_v37 = vld [vmem:[%s2169_s19 + $0x58] sm:$0xff] }
  0xb2   : > { %1432 = vmatpush3.bf16.msra.mxu0 %v1660_v3  ;;  %1509 = vmatpush3.bf16.msra.mxu1 %v1660_v3  ;;  %v401_v38 = vpack.c.bf16 %v387_v37, %v386_v36  ;;  %v1358_v40 = vld [vmem:[%s2602_s15] ss:$0 sm:$0xff] }
  0xb3   : > { %1433 = vmatprep.subr.bf16.mxu0 %v1661_v4  ;;  %1502 = vmatprep.subr.bf16.mxu1 %v1661_v4 }
  0xb6   : > { %1434 = vmatpush3.bf16.msra.mxu0 %v1661_v4  ;;  %1510 = vmatpush3.bf16.msra.mxu1 %v1661_v4 }
  0xb7   : > { %1435 = vmatprep.subr.bf16.mxu0 %v1662_v11  ;;  %1503 = vmatprep.subr.bf16.mxu1 %v1662_v11 }
  0xba   : > { %1436 = vmatpush3.bf16.msra.mxu0 %v1662_v11  ;;  %1511 = vmatpush3.bf16.msra.mxu1 %v1662_v11 }
  0xbb   : > { %1437 = vmatprep.subr.bf16.mxu0 %v1663_v12  ;;  %1504 = vmatprep.subr.bf16.mxu1 %v1663_v12 }
  0xbe   : > { %1438 = vmatpush3.bf16.msra.mxu0 %v1663_v12  ;;  %1512 = vmatpush3.bf16.msra.mxu1 %v1663_v12 }
  0xbf   : > { %1439 = vmatprep.subr.bf16.mxu0 %v1664_v13  ;;  %1505 = vmatprep.subr.bf16.mxu1 %v1664_v13 }
  0xc2   : > { %1440 = vmatpush3.bf16.msra.mxu0 %v1664_v13  ;;  %1513 = vmatpush3.bf16.msra.mxu1 %v1664_v13 }
  0xc3   : > { %1441 = vmatprep.subr.bf16.mxu0 %v1665_v14  ;;  %1506 = vmatprep.subr.bf16.mxu1 %v1665_v14 }
  0xc6   : > { %1442 = vmatpush3.bf16.msra.mxu0 %v1665_v14  ;;  %1514 = vmatpush3.bf16.msra.mxu1 %v1665_v14 }
  0xc9   : > { %1444 = vmatmul.mubr.bf16.vlgmr.msra.gmra.mrb[0].mxu0 %v397_v23  ;;  %1456 = vmatmul.mubr.bf16.vlgmr.msra.gmra.mrb[0].mxu1 %v403_v24 }
  0xca   : > { %1447 = vmatprep.mubr.bf16.mxu0 %v398_v25  ;;  %1459 = vmatprep.mubr.bf16.mxu1 %v404_v26 }
  0xd1   : > { %1448 = vmatmul.mubr.bf16.gmra.mrb[4].mxu0 %v399_v33  ;;  %1460 = vmatmul.mubr.bf16.gmra.mrb[4].mxu1 %v405_v34 }
  0xd2   : > { %1451 = vmatprep.mubr.bf16.mxu0 %v400_v35 }
  0xd9   : > { %1452 = vmatmul.mubr.bf16.gmra.mrb[8].mxu0 %v401_v38 }
 0x19c   : > { %v1445_v39 = vpop.f32.mrb[0].mxu0  ;;  %v1457_v41 = vpop.f32.mrb[0].mxu1 }
 0x19d   : > { %v511_v42 = vpop.f32.mrb[1].mxu0  ;;  %v2210_v43 = vadd.f32 %v1457_v41, %v1358_v40  ;;  %v559_v44 = vpop.f32.mrb[1].mxu1  ;;  %v2214_v48 = vadd.f32 %v1445_v39, %v1358_v40 }
 0x19e   : > { %v1446_v45 = vpop.f32.mrb[2].mxu0  ;;  %v2212_v46 = vadd.f32 %v1358_v40, %v559_v44  ;;  %v1458_v47 = vpop.f32.mrb[2].mxu1  ;;  %v2220_v53 = vadd.f32 %v1358_v40, %v511_v42 }
 0x19f   : > { %v2216_v49 = vadd.f32 %v1446_v45, %v1358_v40  ;;  %v514_v50 = vpop.f32.mrb[3].mxu0  ;;  %v2218_v51 = vadd.f32 %v1458_v47, %v1358_v40  ;;  %v562_v52 = vpop.f32.mrb[3].mxu1  ;;  %v648_v30 = vmul.f32 (!%p1368_p1), %v2214_v48, %v2214_v48 }
 0x1a0   : > { %v2222_v54 = vadd.f32 %v1358_v40, %v514_v50  ;;  %v2224_v55 = vadd.f32 %v1358_v40, %v562_v52  ;;  %v646_v27 = vmul.f32 (!%p1368_p1), %v2220_v53, %v2220_v53 }
 0x1a1   : > { %v591_v56 = vpack.c.bf16 %v2216_v49, %v2214_v48  ;;  %v597_v57 = vpack.c.bf16 %v2218_v51, %v2210_v43  ;;  %v649_v32 = vmul.f32 (!%p1368_p1), %v2216_v49, %v2216_v49 }
 0x1a2   : > { %v590_v58 = vpack.c.bf16 %v2222_v54, %v2220_v53  ;;  %v596_v59 = vpack.c.bf16 %v2224_v55, %v2212_v46  ;;  %v618_v26 = vadd.f32 (!%p1368_p1), %v2222_v54, %v2220_v53  ;;  %v647_v28 = vmul.f32 (!%p1368_p1), %v2222_v54, %v2222_v54 }
 0x1a3   : > { %604 = vst [vmem:[%s2234_s9 + $0x8] sm:$0xff] %v591_v56  ;;  %610 = vst [vmem:[%s2234_s9 + $0x38] sm:$0xff] %v597_v57 }
 0x1a4   : > { %603 = vst [vmem:[%s2234_s9] sm:$0xff] %v590_v58  ;;  %v1449_v60 = vpop.f32.mrb[4].mxu0  ;;  %609 = vst [vmem:[%s2234_s9 + $0x30] sm:$0xff] %v596_v59  ;;  %v1461_v61 = vpop.f32.mrb[4].mxu1  ;;  %v619_v29 = vadd.f32 (!%p1368_p1), %v618_v26, %v2214_v48  ;;  %v666_v33 = vadd.f32 (!%p1368_p1), %v647_v28, %v646_v27 }
 0x1a5   : > { %v527_v62 = vpop.f32.mrb[5].mxu0  ;;  %v2240_v63 = vadd.f32 %v1461_v61, %v1358_v40  ;;  %v575_v0 = vpop.f32.mrb[5].mxu1  ;;  %v2244_v4 = vadd.f32 %v1449_v60, %v1358_v40 }
 0x1a6   : > { %v1450_v1 = vpop.f32.mrb[6].mxu0  ;;  %v2242_v2 = vadd.f32 %v1358_v40, %v575_v0  ;;  %v1462_v3 = vpop.f32.mrb[6].mxu1  ;;  %v2250_v9 = vadd.f32 %v1358_v40, %v527_v62  ;;  %v620_v31 = vadd.f32 (!%p1368_p1), %v619_v29, %v2216_v49  ;;  %v667_v36 = vadd.f32 (!%p1368_p1), %v666_v33, %v648_v30 }
 0x1a7   : > { %v2246_v5 = vadd.f32 %v1450_v1, %v1358_v40  ;;  %v530_v6 = vpop.f32.mrb[7].mxu0  ;;  %v2248_v7 = vadd.f32 %v1462_v3, %v1358_v40  ;;  %v578_v8 = vpop.f32.mrb[7].mxu1  ;;  %v652_v41 = vmul.f32 (!%p1368_p1), %v2244_v4, %v2244_v4  ;;  %v664_v33 = vmul.f32 (!%p1368_p1), %v2240_v63, %v2240_v63 }
 0x1a8   : > { %v2252_v10 = vadd.f32 %v1358_v40, %v530_v6  ;;  %v2254_v11 = vadd.f32 %v1358_v40, %v578_v8  ;;  %v621_v34 = vadd.f32 (!%p1368_p1), %v620_v31, %v2250_v9  ;;  %v650_v35 = vmul.f32 (!%p1368_p1), %v2250_v9, %v2250_v9 }
 0x1a9   : > { %v593_v12 = vpack.c.bf16 %v2246_v5, %v2244_v4  ;;  %v599_v13 = vpack.c.bf16 %v2248_v7, %v2240_v63  ;;  %v668_v39 = vadd.f32 (!%p1368_p1), %v667_v36, %v649_v32  ;;  %v653_v45 = vmul.f32 (!%p1368_p1), %v2246_v5, %v2246_v5 }
 0x1aa   : > { %v592_v14 = vpack.c.bf16 %v2252_v10, %v2250_v9  ;;  %v598_v15 = vpack.c.bf16 %v2254_v11, %v2242_v2  ;;  %v622_v37 = vadd.f32 (!%p1368_p1), %v621_v34, %v2252_v10  ;;  %v651_v38 = vmul.f32 (!%p1368_p1), %v2252_v10, %v2252_v10 }
 0x1ab   : > { %606 = vst [vmem:[%s2234_s9 + $0x18] sm:$0xff] %v593_v12  ;;  %612 = vst [vmem:[%s2234_s9 + $0x48] sm:$0xff] %v599_v13  ;;  %v669_v42 = vadd.f32 (!%p1368_p1), %v668_v39, %v650_v35  ;;  %v658_v8 = vmul.f32 (!%p1368_p1), %v2212_v46, %v2212_v46  ;;  %v662_v27 = vmul.f32 (!%p1368_p1), %v2242_v2, %v2242_v2 }
 0x1ac   : > { %605 = vst [vmem:[%s2234_s9 + $0x10] sm:$0xff] %v592_v14  ;;  %v1453_v16 = vpop.f32.mrb[8].mxu0  ;;  %611 = vst [vmem:[%s2234_s9 + $0x40] sm:$0xff] %v598_v15  ;;  %v659_v14 = vmul.f32 (!%p1368_p1), %v2224_v55, %v2224_v55  ;;  %v663_v30 = vmul.f32 (!%p1368_p1), %v2254_v11, %v2254_v11  ;;  %v665_v36 = vmul.f32 (!%p1368_p1), %v2248_v7, %v2248_v7 }
 0x1ad   : > { %v543_v17 = vpop.f32.mrb[9].mxu0  ;;  %v2268_v19 = vadd.f32 %v1453_v16, %v1358_v40  ;;  %v670_v47 = vadd.f32 (!%p1368_p1), %v669_v42, %v651_v38 }
 0x1ae   : > { %v1454_v18 = vpop.f32.mrb[10].mxu0  ;;  %v2272_v22 = vadd.f32 %v1358_v40, %v543_v17  ;;  %616 = sbr.rel (%p1368_p1) target bundleno = 475 (0x1db), region = 72  ;;  %v660_v17 = vmul.f32 (!%p1368_p1), %v2210_v43, %v2210_v43 }
 0x1af   : > { %v2270_v20 = vadd.f32 %v1454_v18, %v1358_v40  ;;  %v546_v21 = vpop.f32.mrb[11].mxu0  ;;  %v671_v56 = vadd.f32 (!%p1368_p1), %v670_v47, %v652_v41  ;;  %v656_v61 = vmul.f32 (!%p1368_p1), %v2268_v19, %v2268_v19 }
 0x1b0   : > { %v2274_v23 = vadd.f32 %v1358_v40, %v546_v21  ;;  %v623_v40 = vadd.f32 (!%p1368_p1), %v622_v37, %v2244_v4  ;;  %v654_v52 = vmul.f32 (!%p1368_p1), %v2272_v22, %v2272_v22 }
 0x1b1   : > { %v595_v24 = vpack.c.bf16 %v2270_v20, %v2268_v19  ;;  %v672_v59 = vadd.f32 (!%p1368_p1), %v671_v56, %v653_v45  ;;  %v657_v1 = vmul.f32 (!%p1368_p1), %v2270_v20, %v2270_v20 }
 0x1b2   : > { %v594_v25 = vpack.c.bf16 %v2274_v23, %v2272_v22  ;;  %v624_v44 = vadd.f32 (!%p1368_p1), %v623_v40, %v2246_v5  ;;  %v655_v58 = vmul.f32 (!%p1368_p1), %v2274_v23, %v2274_v23 }
 0x1b3   : > { %608 = vst [vmem:[%s2234_s9 + $0x28] sm:$0xff] %v595_v24  ;;  %v673_v62 = vadd.f32 (!%p1368_p1), %v672_v59, %v654_v52  ;;  %v661_v24 = vmul.f32 (!%p1368_p1), %v2218_v51, %v2218_v51  ;;  %v617_v52 = vld [vmem:[#allocation3] sm:$0x1] (!%p1368_p1) }
 0x1b4   : > { %607 = vst [vmem:[%s2234_s9 + $0x20] sm:$0xff] %v594_v25  ;;  %v625_v50 = vadd.f32 (!%p1368_p1), %v624_v44, %v2272_v22 }
 0x1b5   : > { %v674_v3 = vadd.f32 %v673_v62, %v655_v58 }
 0x1b6   : > { %v626_v57 = vadd.f32 %v625_v50, %v2274_v23 }
 0x1b7   : > { %v675_v12 = vadd.f32 %v674_v3, %v656_v61 }
 0x1b8   : > { %v627_v60 = vadd.f32 %v626_v57, %v2268_v19 }
 0x1b9   : > { %v676_v15 = vadd.f32 %v675_v12, %v657_v1 }
 0x1ba   : > { %v628_v0 = vadd.f32 %v627_v60, %v2270_v20  ;;  %v645_v60 = vld [vmem:[#allocation4] sm:$0x1] }
 0x1bb   : > { %v677_v18 = vadd.f32 %v676_v15, %v658_v8 }
 0x1bc   : > { %v629_v6 = vadd.f32 %v628_v0, %v2212_v46 }
 0x1bd   : > { %v678_v25 = vadd.f32 %v677_v18, %v659_v14 }
 0x1be   : > { %v630_v13 = vadd.f32 %v629_v6, %v2224_v55 }
 0x1bf   : > { %v679_v28 = vadd.f32 %v678_v25, %v660_v17 }
 0x1c0   : > { %v631_v16 = vadd.f32 %v630_v13, %v2210_v43 }
 0x1c1   : > { %v680_v31 = vadd.f32 %v679_v28, %v661_v24 }
 0x1c2   : > { %v632_v21 = vadd.f32 %v631_v16, %v2218_v51 }
 0x1c3   : > { %v681_v34 = vadd.f32 %v680_v31, %v662_v27 }
 0x1c4   : > { %v633_v26 = vadd.f32 %v632_v21, %v2242_v2 }
 0x1c5   : > { %v682_v37 = vadd.f32 %v681_v34, %v663_v30 }
 0x1c6   : > { %v634_v29 = vadd.f32 %v633_v26, %v2254_v11 }
 0x1c7   : > { %v683_v39 = vadd.f32 %v682_v37, %v664_v33 }
 0x1c8   : > { %v635_v32 = vadd.f32 %v634_v29, %v2240_v63 }
 0x1c9   : > { %v684_v41 = vadd.f32 %v683_v39, %v665_v36 }
 0x1ca   : > { %v636_v35 = vadd.f32 %v635_v32, %v2248_v7 }
 0x1cb   : > { %v685_v44 = vrot.slane %v684_v41, 4 }
 0x1cc   : > { %v637_v38 = vrot.slane %v636_v35, 4 }
 0x1cd   : > { %v686_v47 = vadd.f32 %v685_v44, %v684_v41 }
 0x1ce   : > { %v638_v40 = vadd.f32 %v637_v38, %v636_v35 }
 0x1cf   : > { %v687_v56 = vrot.slane %v686_v47, 2 }
 0x1d0   : > { %v639_v42 = vrot.slane %v638_v40, 2 }
 0x1d1   : > { %v688_v63 = vadd.f32 %v687_v56, %v686_v47 }
 0x1d2   : > { %v640_v45 = vadd.f32 %v639_v42, %v638_v40 }
 0x1d3   : > { %v689_v59 = vrot.slane %v688_v63, 1 }
 0x1d4   : > { %v641_v50 = vrot.slane %v640_v45, 1 }
 0x1d5   : > { %v690_v61 = vadd.f32 %v689_v59, %v688_v63 }
 0x1d6   : > { %v642_v57 = vadd.f32 %v641_v50, %v640_v45 }
 0x1d7   : > { %v691_v7 = vadd.f32 %v690_v61, %v645_v60 }
 0x1d8   : > { %v643_v58 = vadd.f32 %v642_v57, %v617_v52 }
 0x1d9   : > { %692 = vst [vmem:[#allocation4] sm:$0x1] %v691_v7 }
 0x1da   : > { %644 = vst [vmem:[#allocation3] sm:$0x1] %v643_v58 }
 0x1db PF: > { %p1369_p2 = scmp.ne.s32.totalorder %s1870_s30, 1 }
 0x1dc   : > { %v799_v62 = vadd.f32 (!%p1369_p2), %v2222_v54, %v2220_v53  ;;  %v827_v0 = vmul.f32 (!%p1369_p2), %v2220_v53, %v2220_v53  ;;  %v828_v1 = vmul.f32 (!%p1369_p2), %v2222_v54, %v2222_v54  ;;  %v829_v6 = vmul.f32 (!%p1369_p2), %v2214_v48, %v2214_v48 }
 0x1dd   : > { %696 = sbr.rel (%p1369_p2) target bundleno = 527 (0x20f), region = 76  ;;  %v830_v12 = vmul.f32 (!%p1369_p2), %v2216_v49, %v2216_v49  ;;  %v831_v15 = vmul.f32 (!%p1369_p2), %v2250_v9, %v2250_v9  ;;  %v832_v54 = vmul.f32 (!%p1369_p2), %v2252_v10, %v2252_v10  ;;  %v833_v18 = vmul.f32 (!%p1369_p2), %v2244_v4, %v2244_v4 }
 0x1de   : > { %v800_v3 = vadd.f32 (!%p1369_p2), %v799_v62, %v2214_v48  ;;  %v847_v13 = vadd.f32 (!%p1369_p2), %v828_v1, %v827_v0  ;;  %v834_v24 = vmul.f32 (!%p1369_p2), %v2246_v5, %v2246_v5  ;;  %v697_v26 = vlaneseq (!%p1369_p2) }
 0x1df   : > { %v835_v27 = vmul.f32 (!%p1369_p2), %v2272_v22, %v2272_v22  ;;  %v836_v29 = vmul.f32 (!%p1369_p2), %v2274_v23, %v2274_v23  ;;  %v838_v34 = vmul.f32 (!%p1369_p2), %v2270_v20, %v2270_v20  ;;  %v840_v39 = vmul.f32 (!%p1369_p2), %v2224_v55, %v2224_v55 }
 0x1e0   : > { %v801_v8 = vadd.f32 (!%p1369_p2), %v800_v3, %v2216_v49  ;;  %v848_v53 = vadd.f32 (!%p1369_p2), %v847_v13, %v829_v6  ;;  %v698_v31 = vshrl.u32 (!%p1369_p2), %v697_v26, 7  ;;  %v842_v44 = vmul.f32 (!%p1369_p2), %v2218_v51, %v2218_v51 }
 0x1e1   : > { %v798_v0 = vld [vmem:[#allocation3] sm:$0x1] (!%p1369_p2) }
 0x1e2   : > { %v802_v14 = vadd.f32 (!%p1369_p2), %v801_v8, %v2250_v9  ;;  %v849_v17 = vadd.f32 (!%p1369_p2), %v848_v53, %v830_v12  ;;  %v715_v36 = vadd.s32 (!%p1369_p2), 136, %v698_v31 }
 0x1e4   : > { %v803_v16 = vadd.f32 %v802_v14, %v2252_v10  ;;  %v850_v21 = vadd.f32 %v849_v17, %v831_v15  ;;  %vm735_vm0 = vcmp.lt.s32.totalorder %v715_v36, 140 }
 0x1e5   : > { %v795_v45 = vsel %vm735_vm0, %v2254_v11, 0.0 }
 0x1e6   : > { %v804_v48 = vadd.f32 %v803_v16, %v2244_v4  ;;  %v851_v25 = vadd.f32 %v850_v21, %v832_v54  ;;  %v844_v56 = vmul.f32 %v795_v45, %v795_v45 }
 0x1e8   : > { %v805_v49 = vadd.f32 %v804_v48, %v2246_v5  ;;  %v852_v10 = vadd.f32 %v851_v25, %v833_v18  ;;  %v837_v5 = vmul.f32 %v2268_v19, %v2268_v19 }
 0x1ea   : > { %v806_v9 = vadd.f32 %v805_v49, %v2272_v22  ;;  %v853_v4 = vadd.f32 %v852_v10, %v834_v24 }
 0x1ec   : > { %v807_v28 = vadd.f32 %v806_v9, %v2274_v23  ;;  %v854_v32 = vadd.f32 %v853_v4, %v835_v27  ;;  %v839_v23 = vmul.f32 %v2212_v46, %v2212_v46 }
 0x1ee   : > { %v808_v30 = vadd.f32 %v807_v28, %v2268_v19  ;;  %v855_v22 = vadd.f32 %v854_v32, %v836_v29 }
 0x1f0   : > { %v809_v33 = vadd.f32 %v808_v30, %v2270_v20  ;;  %v856_v37 = vadd.f32 %v855_v22, %v837_v5  ;;  %v841_v20 = vmul.f32 %v2210_v43, %v2210_v43 }
 0x1f2   : > { %v810_v35 = vadd.f32 %v809_v33, %v2212_v46  ;;  %v857_v19 = vadd.f32 %v856_v37, %v838_v34 }
 0x1f4   : > { %v811_v38 = vadd.f32 %v810_v35, %v2224_v55  ;;  %v858_v41 = vadd.f32 %v857_v19, %v839_v23  ;;  %v843_v55 = vmul.f32 %v2242_v2, %v2242_v2 }
 0x1f6   : > { %v812_v40 = vadd.f32 %v811_v38, %v2210_v43  ;;  %v859_v46 = vadd.f32 %v858_v41, %v840_v39 }
 0x1f8   : > { %v813_v42 = vadd.f32 %v812_v40, %v2218_v51  ;;  %v860_v50 = vadd.f32 %v859_v46, %v841_v20 }
 0x1fa   : > { %v814_v47 = vadd.f32 %v813_v42, %v2242_v2  ;;  %v861_v57 = vadd.f32 %v860_v50, %v842_v44  ;;  %v826_v2 = vld [vmem:[#allocation4] sm:$0x1] }
 0x1fc   : > { %v815_v52 = vadd.f32 %v814_v47, %v795_v45  ;;  %v862_v43 = vadd.f32 %v861_v57, %v843_v55 }
 0x1fe   : > { %v818_v63 = vrot.slane %v815_v52, 4  ;;  %v863_v59 = vadd.f32 %v862_v43, %v844_v56 }
 0x200   : > { %v819_v58 = vadd.f32 %v818_v63, %v815_v52  ;;  %v866_v61 = vrot.slane %v863_v59, 4 }
 0x202   : > { %v820_v60 = vrot.slane %v819_v58, 2  ;;  %v867_v51 = vadd.f32 %v866_v61, %v863_v59 }
 0x204   : > { %v821_v7 = vadd.f32 %v820_v60, %v819_v58  ;;  %v868_v11 = vrot.slane %v867_v51, 2 }
 0x206   : > { %v822_v62 = vrot.slane %v821_v7, 1  ;;  %v869_v3 = vadd.f32 %v868_v11, %v867_v51 }
 0x208   : > { %v823_v1 = vadd.f32 %v822_v62, %v821_v7  ;;  %v870_v8 = vrot.slane %v869_v3, 1 }
 0x20a   : > { %v824_v6 = vadd.f32 %v823_v1, %v798_v0  ;;  %v871_v12 = vadd.f32 %v870_v8, %v869_v3 }
 0x20c   : > { %825 = vst [vmem:[#allocation3] sm:$0x1] %v824_v6  ;;  %v872_v13 = vadd.f32 %v871_v12, %v826_v2 }
 0x20e   : > { %873 = vst [vmem:[#allocation4] sm:$0x1] %v872_v13 }
 0x20f PF: > { %p1370_p8 = scmp.ne.s32.totalorder %s1874_s8, 1 }
 0x210   : > { %p1371_p3 = scmp.ne.s32.totalorder (!%p1370_p8), %s1870_s30, 0 }
 0x211   : > { %877 = sbr.rel (%p1370_p8) target bundleno = 832 (0x340), region = 80 }
 0x218   : > { %881 = sbr.rel (%p1371_p3) target bundleno = 565 (0x235), region = 84  ;;  %v882_v14 = vld [vmem:[#allocation3] sm:$0x1] (!%p1371_p3)  ;;  %v884_v15 = vld [vmem:[#allocation4] sm:$0x1] (!%p1371_p3)  ;;  %s2603_s17 = sld [smem:[#allocation25_spill]] (!%p1371_p3) }
 0x219   : > { %v883_v53 = vmul.f32 (!%p1371_p3), 0.0033333334, %v882_v14  ;;  %v885_v16 = vmul.f32 (!%p1371_p3), 0.0033333334, %v884_v15  ;;  %s2604_s23 = sld [smem:[#allocation26_spill]] (!%p1371_p3) }
 0x21b   : > { %v886_v54 = vmul.f32 (!%p1371_p3), %v883_v53, %v883_v53 }
 0x21d   : > { %v887_v17 = vsub.f32 (!%p1371_p3), %v885_v16, %v886_v54 }
 0x21e   : > { %v889_v21 = vld [vmem:[%s2603_s17] sm:$0x1] (!%p1371_p3) }
 0x21f   : > { %v888_v48 = vmax.f32 %v887_v17, 0.0  ;;  %v894_v25 = vld [vmem:[%s2604_s23] sm:$0x1] }
 0x221   : > { %v890_v18 = vadd.f32 1e-05, %v888_v48 }
 0x223   : > { %1666 = vrsqrt.f32 %v890_v18 }
 0x22d   : > { %v1667_v49 = vpop.eup %1666 }
 0x22e   : > { %v892_v24 = vmul.f32 %v1667_v49, %v889_v21 }
 0x230   : > { %893 = vst [vmem:[#allocation5] sm:$0x1] %v892_v24  ;;  %v895_v9 = vmul.f32 %v892_v24, %v883_v53 }
 0x232   : > { %v896_v26 = vsub.f32 %v894_v25, %v895_v9 }
 0x234   : > { %897 = vst [vmem:[#allocation6] sm:$0x1] %v896_v26 }
 0x235 PF: > { %v1668_v27 = vld [vmem:[#allocation12] sm:$0xff]   ;;  %v1669_v10 = vld [vmem:[#allocation12 + $0x8] sm:$0xff]   ;;  %s1389_s10 = smul.u32 80, %s1870_s30  ;;  %v1670_v28 = vld [vmem:[#allocation12 + $0x10] sm:$0xff]   ;;  %s2605_s19 = sld [smem:[#allocation27_spill]] }
 0x236   : > { %1463 = vmatprep.subr.bf16.mxu0 %v1668_v27  ;;  %1515 = vmatprep.subr.bf16.mxu1 %v1668_v27  ;;  %v1671_v29 = vld [vmem:[#allocation12 + $0x18] sm:$0xff]   ;;  %v1672_v40 = vld [vmem:[#allocation12 + $0x20] sm:$0xff]   ;;  %v1673_v43 = vld [vmem:[#allocation12 + $0x28] sm:$0xff]  }
 0x237   : > { %1464 = vmatpush3.bf16.msra.mxu0 %v1668_v27  ;;  %1523 = vmatpush3.bf16.msra.mxu1 %v1668_v27  ;;  %s2405_s3 = scalar_lea.vmem [#allocation2], %s1389_s10  ;;  %v2408_v30 = vld [vmem:[#allocation5] ss:$0 sm:$0xff]  ;;  %v1674_v13 = vld [vmem:[#allocation12 + $0x30] sm:$0xff]  }
 0x238   : > { %1465 = vmatprep.subr.bf16.mxu0 %v1669_v10  ;;  %1516 = vmatprep.subr.bf16.mxu1 %v1669_v10  ;;  %v901_v4 = vld [vmem:[%s2405_s3] sm:$0xff]  ;;  %v902_v32 = vld [vmem:[%s2405_s3 + $0x8] sm:$0xff]  ;;  %v907_v33 = vld [vmem:[%s2405_s3 + $0x30] sm:$0xff] }
 0x239   : > { %v911_v31 = vunpack.c.l.bf16 %v901_v4  ;;  %v912_v5 = vunpack.c.h.bf16 %v901_v4  ;;  %v908_v34 = vld [vmem:[%s2405_s3 + $0x38] sm:$0xff]  ;;  %v913_v35 = vunpack.c.l.bf16 %v902_v32  ;;  %v923_v36 = vunpack.c.l.bf16 %v907_v33  ;;  %v903_v19 = vld [vmem:[%s2405_s3 + $0x10] sm:$0xff]  ;;  %v909_v61 = vld [vmem:[%s2405_s3 + $0x40] sm:$0xff] }
 0x23a   : > { %v924_v23 = vunpack.c.h.bf16 %v907_v33  ;;  %v914_v39 = vunpack.c.h.bf16 %v902_v32  ;;  %v925_v41 = vunpack.c.l.bf16 %v908_v34  ;;  %v926_v42 = vunpack.c.h.bf16 %v908_v34  ;;  %v904_v0 = vld [vmem:[%s2405_s3 + $0x18] sm:$0xff]  ;;  %v910_v12 = vld [vmem:[%s2405_s3 + $0x48] sm:$0xff]  ;;  %v905_v21 = vld [vmem:[%s2405_s3 + $0x20] sm:$0xff] }
 0x23b   : > { %1466 = vmatpush3.bf16.msra.mxu0 %v1669_v10  ;;  %1524 = vmatpush3.bf16.msra.mxu1 %v1669_v10  ;;  %v2413_v22 = vld [vmem:[#allocation6] ss:$0 sm:$0xff]  ;;  %v938_v37 = vmul.f32 %v2408_v30, %v911_v31  ;;  %v939_v38 = vmul.f32 %v2408_v30, %v912_v5  ;;  %v950_v20 = vmul.f32 %v2408_v30, %v923_v36  ;;  %v915_v50 = vunpack.c.l.bf16 %v903_v19 }
 0x23c   : > { %1467 = vmatprep.subr.bf16.mxu0 %v1670_v28  ;;  %1517 = vmatprep.subr.bf16.mxu1 %v1670_v28  ;;  %v951_v45 = vmul.f32 %v2408_v30, %v924_v23  ;;  %v940_v47 = vmul.f32 %v2408_v30, %v913_v35  ;;  %v941_v57 = vmul.f32 %v2408_v30, %v914_v39  ;;  %v916_v62 = vunpack.c.h.bf16 %v903_v19  ;;  %v1675_v10 = vld [vmem:[#allocation12 + $0x38] sm:$0xff]   ;;  %v906_v19 = vld [vmem:[%s2405_s3 + $0x28] sm:$0xff] }
 0x23d   : > { %v965_v44 = vadd.f32 %v2413_v22, %v938_v37  ;;  %v966_v46 = vadd.f32 %v2413_v22, %v939_v38  ;;  %v977_v55 = vadd.f32 %v2413_v22, %v950_v20  ;;  %v952_v59 = vmul.f32 %v2408_v30, %v925_v41 }
 0x23e   : > { %v978_v63 = vadd.f32 %v2413_v22, %v951_v45  ;;  %v953_v60 = vmul.f32 %v2408_v30, %v926_v42  ;;  %v967_v11 = vadd.f32 %v2413_v22, %v940_v47  ;;  %v942_v1 = vmul.f32 %v2408_v30, %v915_v50 }
 0x23f   : > { %1468 = vmatpush3.bf16.msra.mxu0 %v1670_v28  ;;  %1525 = vmatpush3.bf16.msra.mxu1 %v1670_v28  ;;  %v985_v52 = vmax.f32 %v965_v44, 0.0  ;;  %v986_v56 = vmax.f32 %v966_v46, 0.0  ;;  %v997_v58 = vmax.f32 %v977_v55, 0.0  ;;  %v968_v3 = vadd.f32 %v2413_v22, %v941_v57 }
 0x240   : > { %1469 = vmatprep.subr.bf16.mxu0 %v1671_v29  ;;  %1518 = vmatprep.subr.bf16.mxu1 %v1671_v29  ;;  %v998_v51 = vmax.f32 %v978_v63, 0.0  ;;  %v943_v8 = vmul.f32 %v2408_v30, %v916_v62  ;;  %v927_v2 = vunpack.c.l.bf16 %v909_v61  ;;  %v979_v14 = vadd.f32 %v2413_v22, %v952_v59 }
 0x241   : > { %v1005_v7 = vpack.c.bf16 %v986_v56, %v985_v52  ;;  %v980_v15 = vadd.f32 %v2413_v22, %v953_v60  ;;  %v917_v53 = vunpack.c.l.bf16 %v904_v0  ;;  %v928_v16 = vunpack.c.h.bf16 %v909_v61 }
 0x242   : > { %v1011_v6 = vpack.c.bf16 %v998_v51, %v997_v58  ;;  %v969_v54 = vadd.f32 %v2413_v22, %v942_v1  ;;  %v970_v17 = vadd.f32 %v2413_v22, %v943_v8  ;;  %v918_v48 = vunpack.c.h.bf16 %v904_v0 }
 0x243   : > { %1470 = vmatpush3.bf16.msra.mxu0 %v1671_v29  ;;  %1526 = vmatpush3.bf16.msra.mxu1 %v1671_v29  ;;  %v954_v18 = vmul.f32 %v2408_v30, %v927_v2  ;;  %v955_v49 = vmul.f32 %v2408_v30, %v928_v16  ;;  %v929_v24 = vunpack.c.l.bf16 %v910_v12  ;;  %v930_v25 = vunpack.c.h.bf16 %v910_v12 }
 0x244   : > { %1471 = vmatprep.subr.bf16.mxu0 %v1672_v40  ;;  %1519 = vmatprep.subr.bf16.mxu1 %v1672_v40  ;;  %v987_v9 = vmax.f32 %v967_v11, 0.0  ;;  %v988_v26 = vmax.f32 %v968_v3, 0.0  ;;  %v999_v28 = vmax.f32 %v979_v14, 0.0  ;;  %v1000_v29 = vmax.f32 %v980_v15, 0.0 }
 0x245   : > { %1479 = vmatprep.mubr.bf16.mxu0 %v1005_v7  ;;  %1491 = vmatprep.mubr.bf16.mxu1 %v1011_v6  ;;  %v981_v27 = vadd.f32 %v2413_v22, %v954_v18  ;;  %v982_v4 = vadd.f32 %v2413_v22, %v955_v49  ;;  %v919_v31 = vunpack.c.l.bf16 %v905_v21  ;;  %v989_v5 = vmax.f32 %v969_v54, 0.0 }
 0x246   : > { %v990_v32 = vmax.f32 %v970_v17, 0.0  ;;  %v944_v33 = vmul.f32 %v2408_v30, %v917_v53  ;;  %v945_v34 = vmul.f32 %v2408_v30, %v918_v48  ;;  %v956_v35 = vmul.f32 %v2408_v30, %v929_v24 }
 0x247   : > { %1472 = vmatpush3.bf16.msra.mxu0 %v1672_v40  ;;  %1527 = vmatpush3.bf16.msra.mxu1 %v1672_v40  ;;  %v957_v36 = vmul.f32 %v2408_v30, %v930_v25  ;;  %v920_v23 = vunpack.c.h.bf16 %v905_v21  ;;  %v1001_v37 = vmax.f32 %v981_v27, 0.0  ;;  %v1002_v38 = vmax.f32 %v982_v4, 0.0 }
 0x248   : > { %1473 = vmatprep.subr.bf16.mxu0 %v1673_v43  ;;  %1520 = vmatprep.subr.bf16.mxu1 %v1673_v43  ;;  %v946_v39 = vmul.f32 %v2408_v30, %v919_v31  ;;  %v1006_v40 = vpack.c.bf16 %v988_v26, %v987_v9  ;;  %v1012_v41 = vpack.c.bf16 %v1000_v29, %v999_v28  ;;  %v921_v55 = vunpack.c.l.bf16 %v906_v19 }
 0x249   : > { %v947_v20 = vmul.f32 %v2408_v30, %v920_v23  ;;  %v1007_v42 = vpack.c.bf16 %v990_v32, %v989_v5  ;;  %v971_v44 = vadd.f32 %v2413_v22, %v944_v33  ;;  %v972_v46 = vadd.f32 %v2413_v22, %v945_v34 }
 0x24a   : > { %v983_v45 = vadd.f32 %v2413_v22, %v956_v35  ;;  %v984_v47 = vadd.f32 %v2413_v22, %v957_v36  ;;  %v922_v50 = vunpack.c.h.bf16 %v906_v19  ;;  %v1013_v52 = vpack.c.bf16 %v1002_v38, %v1001_v37 }
 0x24b   : > { %1474 = vmatpush3.bf16.msra.mxu0 %v1673_v43  ;;  %1528 = vmatpush3.bf16.msra.mxu1 %v1673_v43  ;;  %v973_v56 = vadd.f32 %v2413_v22, %v946_v39  ;;  %v974_v57 = vadd.f32 %v2413_v22, %v947_v20  ;;  %v991_v63 = vmax.f32 %v971_v44, 0.0  ;;  %v992_v43 = vmax.f32 %v972_v46, 0.0 }
 0x24c   : > { %1475 = vmatprep.subr.bf16.mxu0 %v1674_v13  ;;  %1521 = vmatprep.subr.bf16.mxu1 %v1674_v13  ;;  %v1003_v58 = vmax.f32 %v983_v45, 0.0  ;;  %v1004_v59 = vmax.f32 %v984_v47, 0.0  ;;  %v948_v60 = vmul.f32 %v2408_v30, %v921_v55  ;;  %v949_v61 = vmul.f32 %v2408_v30, %v922_v50  ;;  %v1375_v30 = vld [vmem:[%s2605_s19] ss:$0 sm:$0xff] }
 0x24d   : > { %v993_v7 = vmax.f32 %v973_v56, 0.0  ;;  %v994_v51 = vmax.f32 %v974_v57, 0.0  ;;  %v1008_v62 = vpack.c.bf16 %v992_v43, %v991_v63 }
 0x24e   : > { %v1014_v0 = vpack.c.bf16 %v1004_v59, %v1003_v58  ;;  %v975_v11 = vadd.f32 %v2413_v22, %v948_v60  ;;  %v976_v1 = vadd.f32 %v2413_v22, %v949_v61 }
 0x24f   : > { %1476 = vmatpush3.bf16.msra.mxu0 %v1674_v13  ;;  %1529 = vmatpush3.bf16.msra.mxu1 %v1674_v13  ;;  %v1009_v3 = vpack.c.bf16 %v994_v51, %v993_v7 }
 0x250   : > { %1477 = vmatprep.subr.bf16.mxu0 %v1675_v10  ;;  %1522 = vmatprep.subr.bf16.mxu1 %v1675_v10  ;;  %v995_v6 = vmax.f32 %v975_v11, 0.0  ;;  %v996_v8 = vmax.f32 %v976_v1, 0.0 }
 0x252   : > { %v1010_v2 = vpack.c.bf16 %v996_v8, %v995_v6 }
 0x253   : > { %1478 = vmatpush3.bf16.msra.mxu0 %v1675_v10  ;;  %1530 = vmatpush3.bf16.msra.mxu1 %v1675_v10 }
 0x256   : > { %1480 = vmatmul.mubr.bf16.vlgmr.msra.gmra.mrb[0].mxu0 %v1006_v40  ;;  %1492 = vmatmul.mubr.bf16.vlgmr.msra.gmra.mrb[0].mxu1 %v1012_v41 }
 0x257   : > { %1483 = vmatprep.mubr.bf16.mxu0 %v1007_v42  ;;  %1495 = vmatprep.mubr.bf16.mxu1 %v1013_v52 }
 0x25e   : > { %1484 = vmatmul.mubr.bf16.gmra.mrb[4].mxu0 %v1008_v62  ;;  %1496 = vmatmul.mubr.bf16.gmra.mrb[4].mxu1 %v1014_v0 }
 0x25f   : > { %1487 = vmatprep.mubr.bf16.mxu0 %v1009_v3 }
 0x266   : > { %1488 = vmatmul.mubr.bf16.gmra.mrb[8].mxu0 %v1010_v2 }
 0x329   : > { %v1481_v12 = vpop.f32.mrb[0].mxu0  ;;  %v1493_v13 = vpop.f32.mrb[0].mxu1 }
 0x32a   : > { %v1129_v14 = vadd.f32 %v1481_v12, %v1375_v30  ;;  %v1120_v22 = vpop.f32.mrb[1].mxu0  ;;  %v1177_v15 = vadd.f32 %v1493_v13, %v1375_v30  ;;  %v1168_v53 = vpop.f32.mrb[1].mxu1 }
 0x32b   : > { %v1121_v16 = vadd.f32 %v1375_v30, %v1120_v22  ;;  %v1482_v54 = vpop.f32.mrb[2].mxu0  ;;  %v1169_v17 = vadd.f32 %v1375_v30, %v1168_v53  ;;  %v1494_v48 = vpop.f32.mrb[2].mxu1 }
 0x32c   : > { %1201 = vst [vmem:[%s2182_s4 + $0x10] sm:$0xff] %v1129_v14  ;;  %v1132_v18 = vadd.f32 %v1482_v54, %v1375_v30  ;;  %v1123_v21 = vpop.f32.mrb[3].mxu0  ;;  %1213 = vst [vmem:[%s2182_s4 + $0x70] sm:$0xff] %v1177_v15  ;;  %v1180_v49 = vadd.f32 %v1494_v48, %v1375_v30  ;;  %v1171_v24 = vpop.f32.mrb[3].mxu1 }
 0x32d   : > { %1199 = vst [vmem:[%s2182_s4] sm:$0xff] %v1121_v16  ;;  %v1124_v25 = vadd.f32 %v1375_v30, %v1123_v21  ;;  %1211 = vst [vmem:[%s2182_s4 + $0x60] sm:$0xff] %v1169_v17  ;;  %v1172_v9 = vadd.f32 %v1375_v30, %v1171_v24 }
 0x32e   : > { %1202 = vst [vmem:[%s2182_s4 + $0x18] sm:$0xff] %v1132_v18  ;;  %1214 = vst [vmem:[%s2182_s4 + $0x78] sm:$0xff] %v1180_v49 }
 0x32f   : > { %1200 = vst [vmem:[%s2182_s4 + $0x8] sm:$0xff] %v1124_v25  ;;  %1212 = vst [vmem:[%s2182_s4 + $0x68] sm:$0xff] %v1172_v9 }
 0x331   : > { %v1485_v26 = vpop.f32.mrb[4].mxu0  ;;  %v1497_v27 = vpop.f32.mrb[4].mxu1 }
 0x332   : > { %v1145_v10 = vadd.f32 %v1485_v26, %v1375_v30  ;;  %v1136_v28 = vpop.f32.mrb[5].mxu0  ;;  %v1193_v29 = vadd.f32 %v1497_v27, %v1375_v30  ;;  %v1184_v4 = vpop.f32.mrb[5].mxu1 }
 0x333   : > { %v1137_v31 = vadd.f32 %v1375_v30, %v1136_v28  ;;  %v1486_v5 = vpop.f32.mrb[6].mxu0  ;;  %v1185_v32 = vadd.f32 %v1375_v30, %v1184_v4  ;;  %v1498_v33 = vpop.f32.mrb[6].mxu1 }
 0x334   : > { %1205 = vst [vmem:[%s2182_s4 + $0x30] sm:$0xff] %v1145_v10  ;;  %v1148_v34 = vadd.f32 %v1486_v5, %v1375_v30  ;;  %v1139_v35 = vpop.f32.mrb[7].mxu0  ;;  %1217 = vst [vmem:[%s2182_s4 + $0x90] sm:$0xff] %v1193_v29  ;;  %v1196_v36 = vadd.f32 %v1498_v33, %v1375_v30  ;;  %v1187_v23 = vpop.f32.mrb[7].mxu1 }
 0x335   : > { %1203 = vst [vmem:[%s2182_s4 + $0x20] sm:$0xff] %v1137_v31  ;;  %v1140_v37 = vadd.f32 %v1375_v30, %v1139_v35  ;;  %1215 = vst [vmem:[%s2182_s4 + $0x80] sm:$0xff] %v1185_v32  ;;  %v1188_v38 = vadd.f32 %v1375_v30, %v1187_v23 }
 0x336   : > { %1206 = vst [vmem:[%s2182_s4 + $0x38] sm:$0xff] %v1148_v34  ;;  %1218 = vst [vmem:[%s2182_s4 + $0x98] sm:$0xff] %v1196_v36 }
 0x337   : > { %1204 = vst [vmem:[%s2182_s4 + $0x28] sm:$0xff] %v1140_v37  ;;  %1216 = vst [vmem:[%s2182_s4 + $0x88] sm:$0xff] %v1188_v38 }
 0x339   : > { %v1489_v39 = vpop.f32.mrb[8].mxu0 }
 0x33a   : > { %v1161_v19 = vadd.f32 %v1489_v39, %v1375_v30  ;;  %v1152_v40 = vpop.f32.mrb[9].mxu0 }
 0x33b   : > { %v1153_v20 = vadd.f32 %v1375_v30, %v1152_v40  ;;  %v1490_v41 = vpop.f32.mrb[10].mxu0 }
 0x33c   : > { %1209 = vst [vmem:[%s2182_s4 + $0x50] sm:$0xff] %v1161_v19  ;;  %v1164_v42 = vadd.f32 %v1490_v41, %v1375_v30  ;;  %v1155_v44 = vpop.f32.mrb[11].mxu0 }
 0x33d   : > { %1207 = vst [vmem:[%s2182_s4 + $0x40] sm:$0xff] %v1153_v20  ;;  %v1156_v46 = vadd.f32 %v1375_v30, %v1155_v44 }
 0x33e   : > { %1210 = vst [vmem:[%s2182_s4 + $0x58] sm:$0xff] %v1164_v42 }
 0x33f   : > { %1208 = vst [vmem:[%s2182_s4 + $0x48] sm:$0xff] %v1156_v46 }
 0x340 PF: > { %s1227_s13 = smul.u32 %s1870_s30, %s1874_s8  ;;  %s1234_s22 = sshll.u32 %s2182_s4, 4  ;;  %s2487_s22 = int_to_ptr.vmem [resolvable:$true] %s1234_s22 }
 0x341   : > { %s2606_s9 = sld [smem:[#allocation28_spill]]  ;;  %s2496_s17 = scalar_lea.sflag [#allocation9], %s352_s6 }
 0x342   : > { %s1390_s16 = smul.u32 2560, %s1227_s13  ;;  %s1760_s18 = scalar_lea.vmem %s2487_s22, 2560 }
 0x343   : > { %p1761_p5 = scmp.ne.s32.totalorder %s2487_s22, %s1760_s18  ;;  %p2608_p11 = scmp.ne.s32.totalorder %s2593_s2, 0 }
 0x344   : > { %s1896_s30 = smov [#allocation13]  }
 0x345   : > { %p1762_p6 = pnand %p1761_p5, %p2608_p11  ;;  %s1764_s8 = sshll.u32 %s1896_s30, 4  ;;  %s1765_s8 = int_to_ptr.vmem [resolvable:$false] %s1764_s8 }
 0x346   : > { %s1766_s4 = scalar_lea.vmem %s1765_s8, 5120  ;;  %p1767_p4 = scmp.lt.s32.totalorder %s2487_s22, %s1765_s8 }
 0x347   : > { %s2607_s14 = smov %s2606_s9  ;;  %s2492_s27 = scalar_lea.hbm %s2606_s9, %s1390_s16 }
 0x348   : > { %p1763_p7 = pneg %p1762_p6  ;;  %p1768_p12 = scmp.lt.s32.totalorder %s1766_s4, %s1760_s18 }
 0x34a   : > { %p1769_p10 = por %p1768_p12, %p1767_p4 }
 0x34c   : > { %p1770_p13 = pnand %p1769_p10, %p1763_p7 }
 0x34e   : > { %1773 = shalt.err (!%p1770_p13)
}
 0x34f   : > { %s1774_s6 = scalar_lea.hbm %s2492_s27, 2560  ;;  %s1778_s10 = scalar_lea.hbm %s2607_s14, 5120 }
 0x350   : > { %p1775_p9 = scmp.ne.s32.totalorder %s2492_s27, %s1774_s6  ;;  %p1779_p2 = scmp.lt.u32.totalorder %s2492_s27, %s2607_s14 }
 0x351   : > { %p1780_p8 = scmp.lt.u32.totalorder %s1778_s10, %s1774_s6  ;;  %p1782_p5 = scmp.lt.u32.totalorder %s1774_s6, %s2492_s27 }
 0x352   : > { %p1776_p0 = pnand %p1775_p9, %p2608_p11 }
 0x353   : > { %p1781_p3 = por %p1780_p8, %p1779_p2 }
 0x354   : > { %p1777_p1 = pneg %p1776_p0 }
 0x355   : > { %p1783_p6 = por %p1782_p5, %p1781_p3 }
 0x357   : > { %p1784_p7 = pnand %p1783_p6, %p1777_p1 }
 0x359   : > { %1787 = shalt.err (!%p1784_p7)
}
 0x35a   : > { %s1897_s20 = smov 128   ;;  %s1898_s19 = smov 8  }
 0x35b   : > { %1543 = dma.vmem_to_hbm [thread:$0]  (%p2608_p11), %s2487_s22, 2560, %s2492_s27, %s2496_s17, %s1897_s20, %s1897_s20, %s1898_s19  }
 0x35c PF: > { %p1560_p4 = scmp.ge.s32.totalorder %s1886_s11, 2  ;;  %s1249_s13 = sand.u32 1, %s1846_s24  }
 0x35d   : > { %p2609_p12 = scmp.ne.s32.totalorder %s2595_s12, 0  ;;  %s1250_s16 = scalar_lea.sflag [#allocation9], %s1249_s13 }
 0x35f   : > { %p1553_p10 = pnand %p1560_p4, %p2609_p12 }
 0x361   : > { %1841 = dma.done.wait (!%p1553_p10), %s1250_s16, 2560  }
 0x362   : > { %1843 = vsyncadd (!%p1553_p10), %s1250_s16, 4294964736  ;;  %s24_s11 = sadd.s32 1, %s1886_s11   ;;  %s2610_s15 = sld [smem:[#allocation17_spill]] }
 0x363   : > { %p21_p13 = scmp.ge.s32.totalorder %s24_s11, 6   ;;  %s2611_s26 = sld [smem:[#allocation23_spill]] }
 0x364   : > { %s2612_s2 = sld [smem:[#allocation22_spill]]  ;;  %s2613_s30 = sld [smem:[#allocation18_spill]] }
 0x365   : > { %s2614_s8 = sld [smem:[#allocation19_spill]]  ;;  %s2615_s9 = sld [smem:[#allocation20_spill]] }
 0x366   : > { %s2616_s10 = sld [smem:[#allocation21_spill]]  ;;  %s2617_s24 = smov %s1850_s25 }
 0x367   : > { %s2619_s27 = smov %s1862_s28  ;;  %s2620_s28 = smov %s1866_s29 }
 0x368   : > { %s2618_s25 = smov %s2610_s15  ;;  %23 = sbr.rel (!%p21_p13) target bundleno = 16 (0x10), region = 127 }
 0x36a   : > { %s2621_s29 = smov %s2612_s2 }
 0x36f   :  { %1255 = vsyncpa [#allocation8], 1 }
 0x370   :  { %1257 = vsyncpa [#allocation8 + $0x1], 1 }
 0x371   :  { %1258 = vsyncpa [#allocation11], 1 }
 0x372   :  { %1259 = vsyncpa [#allocation9], 1 }
 0x373   :  { %1261 = vsyncpa [#allocation9 + $0x1], 1 }

</bundles_post_ra>
